<compile_context>
chip_gen: v7x
topology: tpu7x:2x2x1
jax: 0.10.0
libtpu: 0.0.40
codegen_flags: <defaults>
</compile_context>

<pallas_src>
import functools
import warnings

import jax
import jax.numpy as jnp
from jax.experimental import pallas as pl
from jax.experimental.pallas import tpu as pltpu


# ----------------------------------------------------------------------------
# helpers
# ----------------------------------------------------------------------------
def _round_up(n, m):
    return ((n + m - 1) // m) * m


def _ceil_div(a, b):
    return -(-a // b)


def _block_diag(w, pack):
    """[fin, fout] -> block-diagonal [pack*fin, pack*fout] (pack copies of w)."""
    fin, fout = w.shape
    eye = jnp.eye(pack, dtype=w.dtype)
    return (eye[:, None, :, None] * w[None, :, None, :]).reshape(pack * fin, pack * fout)


def _tile_bias(b, pack):
    """[1, fout] -> [1, pack*fout] (one copy per packed point)."""
    return jnp.tile(b, (1, pack))


def _mxu_lane_target():
    """256 lanes on v6e/v7x (256-deep MXU), 128 on v5e / unknown chips."""
    try:
        kind = jax.devices()[0].device_kind.lower()
    except Exception:
        kind = ""
    if "v6" in kind or "v7" in kind:
        return 256
    return 128


def _pick_pack(in_ch, lane_target):
    for lanes in (lane_target, 128):
        if in_ch <= lanes and lanes % in_ch == 0:
            return lanes // in_ch
    if in_ch % 128 != 0:
        warnings.warn(
            "Filter_Layer Pallas kernel: in_ch=%d cannot be packed to a 128-lane "
            "dense layout; falling back to pack=1 (correct, but masked partial "
            "stores and lower MXU utilization)." % in_ch)
    return 1


def _vmem_limit_bytes(tile, lanes_in, lanes_out, weight_bytes, io_itemsize):
    io = 2 * 2 * tile * lanes_in * io_itemsize            # z, x double-buffered
    outs = 2 * tile * (lanes_in + lanes_out) * io_itemsize  # new_z, out double-buffered
    interm = 10 * tile * max(2 * lanes_in, lanes_out) * 4   # fp32 temporaries (generous)
    total = io + outs + 2 * weight_bytes + interm
    # At least the 32 MiB v6e/v7x default (v5e's default is only 16 MiB), and
    # capped safely below v7x's 64 MiB physical VMEM.
    return int(min(max(total, 32 * 1024 * 1024), 56 * 1024 * 1024))


# ----------------------------------------------------------------------------
# one-time weight preparation (hoisted out of the per-call forward path)
# ----------------------------------------------------------------------------
def prepare_filter_layer_params(params, *, pack, mxu_dtype=jnp.bfloat16):
    """Build packed block-diagonal weights once per model.

    Weights are stored in `mxu_dtype` (bf16 by default: MXU-native, half the HBM
    traffic); biases stay fp32 (added after the fp32 accumulation).  omega0 /
    scale0 are folded into the RealGabor weights/biases and the two x-driven
    matmuls (freqs | scale) are fused into a single weight matrix.
    """
    omega0 = params["omega0"].astype(jnp.float32)
    scale0 = params["scale0"].astype(jnp.float32)

    def w(a):
        return _block_diag(a.astype(jnp.float32), pack).astype(mxu_dtype)

    def b(a):
        return _tile_bias(a.astype(jnp.float32), pack)

    wxf = jnp.concatenate([w(params["wf"] * omega0), w(params["ws"] * scale0)], axis=1)
    bxf = jnp.concatenate([b(params["bf"] * omega0), b(params["bs"] * scale0)], axis=1)
    return dict(
        wxf=wxf, bxf=bxf,
        wl=w(params["wl"]), bl=b(params["bl"]),
        wc1=w(params["wc1"]), bc1=b(params["bc1"]),
        wc2=w(params["wc2"]), bc2=b(params["bc2"]),
        wo1=w(params["wo1"]), bo1=b(params["bo1"]),
        wo2=w(params["wo2"]),
    )


# ----------------------------------------------------------------------------
# kernel
# ----------------------------------------------------------------------------
def filter_layer_kernel(
    # tensors (VMEM)
    z_ref, x_ref,
    wxf_ref, bxf_ref,     # fused RealGabor (freqs | scale), omega0/scale0 folded in
    wl_ref, bl_ref,       # self.linear
    wc1_ref, bc1_ref,     # channel attention squeeze
    wc2_ref, bc2_ref,     # channel attention excite
    wo1_ref, bo1_ref,     # out_linear[0]
    wo2_ref,              # out_linear[2] (no bias)
    # outputs
    new_z_ref, out_ref,
):
    mxu = wxf_ref.dtype                     # bf16 (default) or f32
    x = x_ref[...].astype(jnp.float32)      # elementwise math stays fp32
    z = z_ref[...].astype(jnp.float32)
    x_mxu = x.astype(mxu)
    z_mxu = z.astype(mxu)
    lanes = x.shape[-1]                     # pack * in_ch (128-lane dense)

    # ---- RealGaborLayer (single fused matmul): cos(omega) * exp(-scale^2)
    fs = jnp.dot(x_mxu, wxf_ref[...], preferred_element_type=jnp.float32) + bxf_ref[...]
    omega = fs[:, :lanes]                   # 128-lane-aligned split
    scale = fs[:, lanes:]
    filtered = jnp.cos(omega) * jnp.exp(-(scale * scale))

    # ---- new_z = linear(z) * filtered_input
    new_z = (
        jnp.dot(z_mxu, wl_ref[...], preferred_element_type=jnp.float32) + bl_ref[...]
    ) * filtered
    new_z_ref[...] = new_z.astype(new_z_ref.dtype)

    # ---- Channel_Attention: new_z * sigmoid(W2 @ relu(W1 @ new_z + b1) + b2)
    h = jnp.maximum(
        jnp.dot(new_z.astype(mxu), wc1_ref[...], preferred_element_type=jnp.float32)
        + bc1_ref[...],
        0.0,
    )
    y = jax.nn.sigmoid(
        jnp.dot(h.astype(mxu), wc2_ref[...], preferred_element_type=jnp.float32)
        + bc2_ref[...]
    )
    ca = new_z * y

    # ---- out = Linear(LeakyReLU(Linear(ca + x)))
    t = jnp.dot((ca + x).astype(mxu), wo1_ref[...],
                preferred_element_type=jnp.float32) + bo1_ref[...]
    t = jnp.where(t > 0, t, 0.01 * t)       # nn.LeakyReLU default slope = 0.01
    out = jnp.dot(t.astype(mxu), wo2_ref[...], preferred_element_type=jnp.float32)
    out_ref[...] = out.astype(out_ref.dtype)


# ----------------------------------------------------------------------------
# forward wrapper (cheap per-call work only: pad, reshape, pallas_call)
# ----------------------------------------------------------------------------
def filter_layer_forward(z, x, packed, *, row_tile=1024, split_for_two_cores=True):
    N, in_ch = x.shape
    lanes_in = packed["wl"].shape[0]
    lanes_out = packed["wo2"].shape[1]
    pack = lanes_in // in_ch
    out_ch = lanes_out // pack
    io_dtype = z.dtype

    # Pad N so it packs evenly into pack*in_ch-wide rows.
    n_pad = _round_up(N, pack)
    if n_pad != N:
        z = jnp.pad(z, ((0, n_pad - N), (0, 0)))
        x = jnp.pad(x, ((0, n_pad - N), (0, 0)))
    np_rows = n_pad // pack
    zp = z.reshape(np_rows, lanes_in)
    xp = x.reshape(np_rows, lanes_in)

    # Row tile: as large as requested, but >= 2 grid steps when there is enough
    # work so the "parallel" axis can shard across v7x's two TensorCores.
    tile = min(row_tile, _round_up(np_rows, 8))
    if split_for_two_cores and np_rows >= 16:
        tile = min(tile, _round_up(_ceil_div(np_rows, 2), 8))
    rows_pad = _round_up(np_rows, tile)
    if rows_pad != np_rows:
        zp = jnp.pad(zp, ((0, rows_pad - np_rows), (0, 0)))
        xp = jnp.pad(xp, ((0, rows_pad - np_rows), (0, 0)))
    grid = (rows_pad // tile,)

    def row_spec(d):
        return pl.BlockSpec((tile, d), lambda i: (i, 0))

    def full_spec(shape):
        # Constant block index -> weight DMA'd once, not per grid step.
        return pl.BlockSpec(shape, lambda i: tuple(0 for _ in shape))

    w = packed
    in_specs = [
        row_spec(lanes_in),                                   # z (packed)
        row_spec(lanes_in),                                   # x (packed)
        full_spec(w["wxf"].shape), full_spec(w["bxf"].shape),
        full_spec(w["wl"].shape),  full_spec(w["bl"].shape),
        full_spec(w["wc1"].shape), full_spec(w["bc1"].shape),
        full_spec(w["wc2"].shape), full_spec(w["bc2"].shape),
        full_spec(w["wo1"].shape), full_spec(w["bo1"].shape),
        full_spec(w["wo2"].shape),
    ]
    out_specs = (row_spec(lanes_in), row_spec(lanes_out))
    out_shape = (
        jax.ShapeDtypeStruct((rows_pad, lanes_in), io_dtype),
        jax.ShapeDtypeStruct((rows_pad, lanes_out), io_dtype),
    )

    weight_bytes = sum(int(v.size) * jnp.dtype(v.dtype).itemsize for v in w.values())
    vmem_limit = _vmem_limit_bytes(
        tile, lanes_in, lanes_out, weight_bytes, jnp.dtype(io_dtype).itemsize)

    new_z_p, out_p = pl.pallas_call(
        filter_layer_kernel,
        out_shape=out_shape,
        grid_spec=pltpu.PrefetchScalarGridSpec(
            num_scalar_prefetch=0,
            grid=grid,
            in_specs=in_specs,
            out_specs=out_specs,
        ),
        compiler_params=pltpu.CompilerParams(
            dimension_semantics=("parallel",),
            vmem_limit_bytes=vmem_limit,
        ),
    )(zp, xp,
      w["wxf"], w["bxf"], w["wl"], w["bl"],
      w["wc1"], w["bc1"], w["wc2"], w["bc2"],
      w["wo1"], w["bo1"], w["wo2"])

    # Unpack: drop row padding, undo the point packing, drop N padding.
    new_z = new_z_p[:np_rows].reshape(n_pad, in_ch)[:N]
    out = out_p[:np_rows].reshape(n_pad, out_ch)[:N]
    return new_z, out


# ----------------------------------------------------------------------------
# pure-JAX reference of Filter_Layer.forward (filter='real-gabor')
# ----------------------------------------------------------------------------
def reference_forward(z, x, p, mxu_dtype=jnp.float32):
    """mxu_dtype=float32 -> exact fp32 semantics of the PyTorch module.
    mxu_dtype=bfloat16 -> mirrors the kernel's bf16-operand / fp32-accumulate
    matmul rounding (same omega0/scale0 folding order)."""
    def dot(a, b):
        return jnp.dot(a.astype(mxu_dtype), b.astype(mxu_dtype),
                       preferred_element_type=jnp.float32)

    omega = dot(x, p["wf"] * p["omega0"]) + p["bf"] * p["omega0"]
    scale = dot(x, p["ws"] * p["scale0"]) + p["bs"] * p["scale0"]
    filtered = jnp.cos(omega) * jnp.exp(-(scale ** 2))
    new_z = (dot(z, p["wl"]) + p["bl"]) * filtered
    h = jnp.maximum(dot(new_z, p["wc1"]) + p["bc1"], 0.0)
    y = jax.nn.sigmoid(dot(h, p["wc2"]) + p["bc2"])
    ca = new_z * y
    t = dot(ca + x, p["wo1"]) + p["bo1"]
    t = jnp.where(t > 0, t, 0.01 * t)
    out = dot(t, p["wo2"])
    return new_z, out


def init_params(key, in_ch, mid_ch, out_ch, reduction=8):
    red = in_ch // reduction
    ks = jax.random.split(key, 16)

    def lin(kw, kb, fan_in, fan_out, bias=True):
        bound = 1.0 / jnp.sqrt(fan_in)
        w = jax.random.uniform(kw, (fan_in, fan_out), jnp.float32, -bound, bound)
        b = (
            jax.random.uniform(kb, (1, fan_out), jnp.float32, -bound, bound)
            if bias else None
        )
        return w, b

    wf, bf = lin(ks[0], ks[1], in_ch, in_ch)
    ws, bs = lin(ks[2], ks[3], in_ch, in_ch)
    wl, bl = lin(ks[4], ks[5], in_ch, in_ch)
    wc1, bc1 = lin(ks[6], ks[7], in_ch, red)
    wc2, bc2 = lin(ks[8], ks[9], red, in_ch)
    wo1, bo1 = lin(ks[10], ks[11], in_ch, mid_ch)
    wo2, _ = lin(ks[12], ks[13], mid_ch, out_ch, bias=False)

    return dict(
        omega0=jnp.asarray(10.0, jnp.float32), scale0=jnp.asarray(10.0, jnp.float32),
        wf=wf, bf=bf, ws=ws, bs=bs, wl=wl, bl=bl,
        wc1=wc1, bc1=bc1, wc2=wc2, bc2=bc2,
        wo1=wo1, bo1=bo1, wo2=wo2,
    )


if __name__ == "__main__":
    # Small shapes; N deliberately not a power of two to exercise the padding path.
    N, in_ch, mid_ch, out_ch = 200, 32, 64, 32

    key = jax.random.PRNGKey(0)
    kz, kx, kp = jax.random.split(key, 3)
    z = jax.random.normal(kz, (N, in_ch), jnp.float32)
    x = jax.random.normal(kx, (N, in_ch), jnp.float32)
    params = init_params(kp, in_ch, mid_ch, out_ch)

    # Generation-aware packing (256 lanes on v6e/v7x, 128 on v5e / unknown).
    pack = _pick_pack(in_ch, _mxu_lane_target())
    fwd = jax.jit(functools.partial(filter_layer_forward, row_tile=1024))

    # --- fp32 MXU mode: tight semantic check against the pure-JAX reference.
    packed_f32 = jax.block_until_ready(
        prepare_filter_layer_params(params, pack=pack, mxu_dtype=jnp.float32))
    new_z_f32, out_f32 = jax.block_until_ready(fwd(z, x, packed_f32))
    ref_nz, ref_out = reference_forward(z, x, params)
    assert new_z_f32.shape == (N, in_ch) and out_f32.shape == (N, out_ch)
    assert jnp.allclose(new_z_f32, ref_nz, atol=1e-4, rtol=1e-4)
    assert jnp.allclose(out_f32, ref_out, atol=1e-4, rtol=1e-4)

    # --- default bf16 MXU mode (perf path): check against the bf16-mirrored
    #     reference (same rounding points), plus a loose sanity check vs fp32.
    packed_bf16 = jax.block_until_ready(
        prepare_filter_layer_params(params, pack=pack, mxu_dtype=jnp.bfloat16))
    new_z_bf, out_bf = jax.block_until_ready(fwd(z, x, packed_bf16))
    mref_nz, mref_out = reference_forward(z, x, params, mxu_dtype=jnp.bfloat16)
    assert jnp.allclose(new_z_bf, mref_nz, atol=1e-2, rtol=1e-2)
    assert jnp.allclose(out_bf, mref_out, atol=1e-2, rtol=1e-2)

    def rel_l2(a, b):
        return float(jnp.linalg.norm(a - b) / (jnp.linalg.norm(b) + 1e-12))

    assert rel_l2(new_z_bf, ref_nz) < 0.15   # bf16 rounding of omega0-scaled args dominates
    assert rel_l2(out_bf, ref_out) < 0.15

    print("KERNEL_OK")
</pallas_src>

<mosaic_0001>
module attributes {stable_mosaic.version = 11 : i64} {
  func.func @filter_layer_kernel(%arg0: i32, %arg1: memref<32x128xf32, #tpu.memory_space<vmem>>, %arg2: memref<32x128xf32, #tpu.memory_space<vmem>>, %arg3: memref<128x256xf32, #tpu.memory_space<vmem>>, %arg4: memref<1x256xf32, #tpu.memory_space<vmem>>, %arg5: memref<128x128xf32, #tpu.memory_space<vmem>>, %arg6: memref<1x128xf32, #tpu.memory_space<vmem>>, %arg7: memref<128x16xf32, #tpu.memory_space<vmem>>, %arg8: memref<1x16xf32, #tpu.memory_space<vmem>>, %arg9: memref<16x128xf32, #tpu.memory_space<vmem>>, %arg10: memref<1x128xf32, #tpu.memory_space<vmem>>, %arg11: memref<128x256xf32, #tpu.memory_space<vmem>>, %arg12: memref<1x256xf32, #tpu.memory_space<vmem>>, %arg13: memref<256x128xf32, #tpu.memory_space<vmem>>, %arg14: memref<32x128xf32, #tpu.memory_space<vmem>>, %arg15: memref<32x128xf32, #tpu.memory_space<vmem>>) attributes {dimension_semantics = [#tpu.dimension_semantics<parallel>], iteration_bounds = array<i64: 2>, scalar_prefetch = 0 : i64, scratch_operands = 0 : i64, tpu.core_type = #tpu.core_type<tc>, window_params = [{transform_indices = @transform_0, window_bounds = array<i64: 32, 128>}, {transform_indices = @transform_1, window_bounds = array<i64: 32, 128>}, {pipeline_mode = #tpu.pipeline_mode<synchronous>, transform_indices = @transform_2, window_bounds = array<i64: 128, 256>}, {pipeline_mode = #tpu.pipeline_mode<synchronous>, transform_indices = @transform_3, window_bounds = array<i64: 1, 256>}, {pipeline_mode = #tpu.pipeline_mode<synchronous>, transform_indices = @transform_4, window_bounds = array<i64: 128, 128>}, {pipeline_mode = #tpu.pipeline_mode<synchronous>, transform_indices = @transform_5, window_bounds = array<i64: 1, 128>}, {pipeline_mode = #tpu.pipeline_mode<synchronous>, transform_indices = @transform_6, window_bounds = array<i64: 128, 16>}, {pipeline_mode = #tpu.pipeline_mode<synchronous>, transform_indices = @transform_7, window_bounds = array<i64: 1, 16>}, {pipeline_mode = #tpu.pipeline_mode<synchronous>, transform_indices = @transform_8, window_bounds = array<i64: 16, 128>}, {pipeline_mode = #tpu.pipeline_mode<synchronous>, transform_indices = @transform_9, window_bounds = array<i64: 1, 128>}, {pipeline_mode = #tpu.pipeline_mode<synchronous>, transform_indices = @transform_10, window_bounds = array<i64: 128, 256>}, {pipeline_mode = #tpu.pipeline_mode<synchronous>, transform_indices = @transform_11, window_bounds = array<i64: 1, 256>}, {pipeline_mode = #tpu.pipeline_mode<synchronous>, transform_indices = @transform_12, window_bounds = array<i64: 256, 128>}, {transform_indices = @transform_13, window_bounds = array<i64: 32, 128>}, {transform_indices = @transform_14, window_bounds = array<i64: 32, 128>}]} {
    %c0 = arith.constant 0 : index
    %c0_0 = arith.constant 0 : index
    %0 = vector.load %arg2[%c0, %c0_0] : memref<32x128xf32, #tpu.memory_space<vmem>>, vector<32x128xf32>
    %c0_1 = arith.constant 0 : index
    %c0_2 = arith.constant 0 : index
    %1 = vector.load %arg1[%c0_1, %c0_2] : memref<32x128xf32, #tpu.memory_space<vmem>>, vector<32x128xf32>
    %c0_3 = arith.constant 0 : index
    %c0_4 = arith.constant 0 : index
    %2 = vector.load %arg3[%c0_3, %c0_4] : memref<128x256xf32, #tpu.memory_space<vmem>>, vector<128x256xf32>
    %cst = arith.constant dense<0.000000e+00> : vector<32x256xf32>
    %3 = tpu.matmul %0, %2, %cst {dimension_numbers = #tpu.dot_dimension_numbers<[1], [0], [0], [1], [0, 0, 1, 1], [], []>} : vector<32x128xf32>, vector<128x256xf32>, vector<32x256xf32> -> vector<32x256xf32>
    %c0_5 = arith.constant 0 : index
    %c0_6 = arith.constant 0 : index
    %4 = vector.load %arg4[%c0_5, %c0_6] : memref<1x256xf32, #tpu.memory_space<vmem>>, vector<1x256xf32>
    %5 = vector.broadcast %4 : vector<1x256xf32> to vector<32x256xf32>
    %6 = arith.addf %3, %5 : vector<32x256xf32>
    %7 = vector.extract_strided_slice %6 {offsets = [0, 0], sizes = [32, 128], strides = [1, 1]} : vector<32x256xf32> to vector<32x128xf32>
    %8 = vector.extract_strided_slice %6 {offsets = [0, 128], sizes = [32, 128], strides = [1, 1]} : vector<32x256xf32> to vector<32x128xf32>
    %9 = math.cos %7 : vector<32x128xf32>
    %10 = arith.mulf %8, %8 : vector<32x128xf32>
    %cst_7 = arith.constant 0.000000e+00 : f32
    %11 = vector.broadcast %cst_7 : f32 to vector<32x128xf32>
    %12 = arith.subf %11, %10 : vector<32x128xf32>
    %13 = math.exp %12 : vector<32x128xf32>
    %14 = arith.mulf %9, %13 : vector<32x128xf32>
    %c0_8 = arith.constant 0 : index
    %c0_9 = arith.constant 0 : index
    %15 = vector.load %arg5[%c0_8, %c0_9] : memref<128x128xf32, #tpu.memory_space<vmem>>, vector<128x128xf32>
    %cst_10 = arith.constant dense<0.000000e+00> : vector<32x128xf32>
    %16 = tpu.matmul %1, %15, %cst_10 {dimension_numbers = #tpu.dot_dimension_numbers<[1], [0], [0], [1], [0, 0, 1, 1], [], []>} : vector<32x128xf32>, vector<128x128xf32>, vector<32x128xf32> -> vector<32x128xf32>
    %c0_11 = arith.constant 0 : index
    %c0_12 = arith.constant 0 : index
    %17 = vector.load %arg6[%c0_11, %c0_12] : memref<1x128xf32, #tpu.memory_space<vmem>>, vector<1x128xf32>
    %18 = vector.broadcast %17 : vector<1x128xf32> to vector<32x128xf32>
    %19 = arith.addf %16, %18 : vector<32x128xf32>
    %20 = arith.mulf %19, %14 : vector<32x128xf32>
    %c0_13 = arith.constant 0 : index
    %c0_14 = arith.constant 0 : index
    %21 = vector.load %arg14[%c0_13, %c0_14] : memref<32x128xf32, #tpu.memory_space<vmem>>, vector<32x128xf32>
    tpu.vector_store %arg14[%c0_13, %c0_14], %20 {strides = array<i32>} : memref<32x128xf32, #tpu.memory_space<vmem>>, vector<32x128xf32>,
    %c0_15 = arith.constant 0 : index
    %c0_16 = arith.constant 0 : index
    %22 = vector.load %arg7[%c0_15, %c0_16] : memref<128x16xf32, #tpu.memory_space<vmem>>, vector<128x16xf32>
    %cst_17 = arith.constant dense<0.000000e+00> : vector<32x16xf32>
    %23 = tpu.matmul %20, %22, %cst_17 {dimension_numbers = #tpu.dot_dimension_numbers<[1], [0], [0], [1], [0, 0, 1, 1], [], []>} : vector<32x128xf32>, vector<128x16xf32>, vector<32x16xf32> -> vector<32x16xf32>
    %c0_18 = arith.constant 0 : index
    %c0_19 = arith.constant 0 : index
    %24 = vector.load %arg8[%c0_18, %c0_19] : memref<1x16xf32, #tpu.memory_space<vmem>>, vector<1x16xf32>
    %25 = vector.broadcast %24 : vector<1x16xf32> to vector<32x16xf32>
    %26 = arith.addf %23, %25 : vector<32x16xf32>
    %cst_20 = arith.constant 0.000000e+00 : f32
    %27 = vector.broadcast %cst_20 : f32 to vector<32x16xf32>
    %28 = arith.maximumf %26, %27 : vector<32x16xf32>
    %c0_21 = arith.constant 0 : index
    %c0_22 = arith.constant 0 : index
    %29 = vector.load %arg9[%c0_21, %c0_22] : memref<16x128xf32, #tpu.memory_space<vmem>>, vector<16x128xf32>
    %cst_23 = arith.constant dense<0.000000e+00> : vector<32x128xf32>
    %30 = tpu.matmul %28, %29, %cst_23 {dimension_numbers = #tpu.dot_dimension_numbers<[1], [0], [0], [1], [0, 0, 1, 1], [], []>} : vector<32x16xf32>, vector<16x128xf32>, vector<32x128xf32> -> vector<32x128xf32>
    %c0_24 = arith.constant 0 : index
    %c0_25 = arith.constant 0 : index
    %31 = vector.load %arg10[%c0_24, %c0_25] : memref<1x128xf32, #tpu.memory_space<vmem>>, vector<1x128xf32>
    %32 = vector.broadcast %31 : vector<1x128xf32> to vector<32x128xf32>
    %33 = arith.addf %30, %32 : vector<32x128xf32>
    %34 = arith.negf %33 : vector<32x128xf32>
    %35 = math.exp %34 : vector<32x128xf32>
    %cst_26 = arith.constant 1.000000e+00 : f32
    %36 = vector.broadcast %cst_26 : f32 to vector<32x128xf32>
    %37 = arith.addf %36, %35 : vector<32x128xf32>
    %38 = arith.divf %36, %37 : vector<32x128xf32>
    %39 = arith.mulf %20, %38 : vector<32x128xf32>
    %40 = arith.addf %39, %0 : vector<32x128xf32>
    %c0_27 = arith.constant 0 : index
    %c0_28 = arith.constant 0 : index
    %41 = vector.load %arg11[%c0_27, %c0_28] : memref<128x256xf32, #tpu.memory_space<vmem>>, vector<128x256xf32>
    %cst_29 = arith.constant dense<0.000000e+00> : vector<32x256xf32>
    %42 = tpu.matmul %40, %41, %cst_29 {dimension_numbers = #tpu.dot_dimension_numbers<[1], [0], [0], [1], [0, 0, 1, 1], [], []>} : vector<32x128xf32>, vector<128x256xf32>, vector<32x256xf32> -> vector<32x256xf32>
    %c0_30 = arith.constant 0 : index
    %c0_31 = arith.constant 0 : index
    %43 = vector.load %arg12[%c0_30, %c0_31] : memref<1x256xf32, #tpu.memory_space<vmem>>, vector<1x256xf32>
    %44 = vector.broadcast %43 : vector<1x256xf32> to vector<32x256xf32>
    %45 = arith.addf %42, %44 : vector<32x256xf32>
    %cst_32 = arith.constant 0.000000e+00 : f32
    %46 = vector.broadcast %cst_32 : f32 to vector<32x256xf32>
    %47 = arith.cmpf ogt, %45, %46 : vector<32x256xf32>
    %cst_33 = arith.constant 0.00999999977 : f32
    %48 = vector.broadcast %cst_33 : f32 to vector<32x256xf32>
    %49 = arith.mulf %48, %45 : vector<32x256xf32>
    %50 = arith.select %47, %45, %49 : vector<32x256xi1>, vector<32x256xf32>
    %c0_34 = arith.constant 0 : index
    %c0_35 = arith.constant 0 : index
    %51 = vector.load %arg13[%c0_34, %c0_35] : memref<256x128xf32, #tpu.memory_space<vmem>>, vector<256x128xf32>
    %cst_36 = arith.constant dense<0.000000e+00> : vector<32x128xf32>
    %52 = tpu.matmul %50, %51, %cst_36 {dimension_numbers = #tpu.dot_dimension_numbers<[1], [0], [0], [1], [0, 0, 1, 1], [], []>} : vector<32x256xf32>, vector<256x128xf32>, vector<32x128xf32> -> vector<32x128xf32>
    %c0_37 = arith.constant 0 : index
    %c0_38 = arith.constant 0 : index
    %53 = vector.load %arg15[%c0_37, %c0_38] : memref<32x128xf32, #tpu.memory_space<vmem>>, vector<32x128xf32>
    tpu.vector_store %arg15[%c0_37, %c0_38], %52 {strides = array<i32>} : memref<32x128xf32, #tpu.memory_space<vmem>>, vector<32x128xf32>,
    return
  }
  func.func @transform_0(%arg0: i32) -> (i32, i32) {
    %c0_i32 = arith.constant 0 : i32
    %c0_i32_0 = arith.constant 0 : i32
    return %arg0, %c0_i32 : i32, i32
  }
  func.func @transform_1(%arg0: i32) -> (i32, i32) {
    %c0_i32 = arith.constant 0 : i32
    %c0_i32_0 = arith.constant 0 : i32
    return %arg0, %c0_i32 : i32, i32
  }
  func.func @transform_2(%arg0: i32) -> (i32, i32) {
    %c0_i32 = arith.constant 0 : i32
    %c0_i32_0 = arith.constant 0 : i32
    %c0_i32_1 = arith.constant 0 : i32
    return %c0_i32, %c0_i32_0 : i32, i32
  }
  func.func @transform_3(%arg0: i32) -> (i32, i32) {
    %c0_i32 = arith.constant 0 : i32
    %c0_i32_0 = arith.constant 0 : i32
    %c0_i32_1 = arith.constant 0 : i32
    return %c0_i32, %c0_i32_0 : i32, i32
  }
  func.func @transform_4(%arg0: i32) -> (i32, i32) {
    %c0_i32 = arith.constant 0 : i32
    %c0_i32_0 = arith.constant 0 : i32
    %c0_i32_1 = arith.constant 0 : i32
    return %c0_i32, %c0_i32_0 : i32, i32
  }
  func.func @transform_5(%arg0: i32) -> (i32, i32) {
    %c0_i32 = arith.constant 0 : i32
    %c0_i32_0 = arith.constant 0 : i32
    %c0_i32_1 = arith.constant 0 : i32
    return %c0_i32, %c0_i32_0 : i32, i32
  }
  func.func @transform_6(%arg0: i32) -> (i32, i32) {
    %c0_i32 = arith.constant 0 : i32
    %c0_i32_0 = arith.constant 0 : i32
    %c0_i32_1 = arith.constant 0 : i32
    return %c0_i32, %c0_i32_0 : i32, i32
  }
  func.func @transform_7(%arg0: i32) -> (i32, i32) {
    %c0_i32 = arith.constant 0 : i32
    %c0_i32_0 = arith.constant 0 : i32
    %c0_i32_1 = arith.constant 0 : i32
    return %c0_i32, %c0_i32_0 : i32, i32
  }
  func.func @transform_8(%arg0: i32) -> (i32, i32) {
    %c0_i32 = arith.constant 0 : i32
    %c0_i32_0 = arith.constant 0 : i32
    %c0_i32_1 = arith.constant 0 : i32
    return %c0_i32, %c0_i32_0 : i32, i32
  }
  func.func @transform_9(%arg0: i32) -> (i32, i32) {
    %c0_i32 = arith.constant 0 : i32
    %c0_i32_0 = arith.constant 0 : i32
    %c0_i32_1 = arith.constant 0 : i32
    return %c0_i32, %c0_i32_0 : i32, i32
  }
  func.func @transform_10(%arg0: i32) -> (i32, i32) {
    %c0_i32 = arith.constant 0 : i32
    %c0_i32_0 = arith.constant 0 : i32
    %c0_i32_1 = arith.constant 0 : i32
    return %c0_i32, %c0_i32_0 : i32, i32
  }
  func.func @transform_11(%arg0: i32) -> (i32, i32) {
    %c0_i32 = arith.constant 0 : i32
    %c0_i32_0 = arith.constant 0 : i32
    %c0_i32_1 = arith.constant 0 : i32
    return %c0_i32, %c0_i32_0 : i32, i32
  }
  func.func @transform_12(%arg0: i32) -> (i32, i32) {
    %c0_i32 = arith.constant 0 : i32
    %c0_i32_0 = arith.constant 0 : i32
    %c0_i32_1 = arith.constant 0 : i32
    return %c0_i32, %c0_i32_0 : i32, i32
  }
  func.func @transform_13(%arg0: i32) -> (i32, i32) {
    %c0_i32 = arith.constant 0 : i32
    %c0_i32_0 = arith.constant 0 : i32
    return %arg0, %c0_i32 : i32, i32
  }
  func.func @transform_14(%arg0: i32) -> (i32, i32) {
    %c0_i32 = arith.constant 0 : i32
    %c0_i32_0 = arith.constant 0 : i32
    return %arg0, %c0_i32 : i32, i32
  }
}

</mosaic_0001>

<bundles_post_ra>
// kernel: filter_layer_forward.1
= control target key start
LH: loop header
LB: loop body
LE: loop exit
PB: predicated region body
PF: predicated region fallthrough
CT: control target
= control target key end

     0   :  { %s2390_s29 = smov 0   ;;  %s3243_s0 = inlined_call_operand.vmem [shape: f32[64,128], index: 0, kind: input, shape index: {}]   ;;  %s3244_s1 = inlined_call_operand.vmem [shape: f32[64,128], index: 1, kind: input, shape index: {}]   ;;  %s3245_s2 = inlined_call_operand.vmem [shape: f32[128,256], index: 2, kind: input, shape index: {}]   ;;  %s3246_s3 = inlined_call_operand.vmem [shape: f32[1,256], index: 3, kind: input, shape index: {}]   ;;  %s3247_s4 = inlined_call_operand.vmem [shape: f32[128,128], index: 4, kind: input, shape index: {}]   ;;  %s3248_s5 = inlined_call_operand.vmem [shape: f32[1,128], index: 5, kind: input, shape index: {}]   ;;  %s3249_s6 = inlined_call_operand.vmem [shape: f32[128,16], index: 6, kind: input, shape index: {}]   ;;  %s3250_s7 = inlined_call_operand.vmem [shape: f32[1,16], index: 7, kind: input, shape index: {}]   ;;  %s3251_s8 = inlined_call_operand.vmem [shape: f32[16,128], index: 8, kind: input, shape index: {}]   ;;  %s3252_s9 = inlined_call_operand.vmem [shape: f32[1,128], index: 9, kind: input, shape index: {}]   ;;  %s3253_s10 = inlined_call_operand.vmem [shape: f32[128,256], index: 10, kind: input, shape index: {}]   ;;  %s3254_s11 = inlined_call_operand.vmem [shape: f32[1,256], index: 11, kind: input, shape index: {}]   ;;  %s3255_s12 = inlined_call_operand.vmem [shape: f32[256,128], index: 12, kind: input, shape index: {}]   ;;  %s3256_s13 = inlined_call_operand.vmem [shape: f32[64,128], index: 13, kind: output, shape index: {0}]   ;;  %s3257_s14 = inlined_call_operand.vmem [shape: f32[64,128], index: 14, kind: output, shape index: {1}]  }
   0x1 LB: > { %s1827_s30 = sadd.s32 4294967295, %s2306_s29   ;;  %p1831_p0 = scmp.ge.s32.totalorder %s2306_s29, 1  ;;  %s2306_s29 = sphi %s2390_s29, %s25_s29  }
   0x2   : > { %p427_p1 = scmp.lt.s32.totalorder %s2306_s29, 3 }
   0x4   : > { %p428_p2 = pnand %p1831_p0, %p427_p1 }
   0x5   : > { %v516_v0 = vld [vmem:[%s3245_s2 + $0x8] sm:$0xff] (!%p428_p2)  ;;  %v518_v1 = vld [vmem:[%s3245_s2 + $0x18] sm:$0xff] (!%p428_p2)  ;;  %v515_v2 = vld [vmem:[%s3245_s2] sm:$0xff] (!%p428_p2)  ;;  %v2308_v7 = vmov (!%p428_p2), 0.0   ;;  %s1832_s19 = sshll.u32 (!%p428_p2), %s1827_s30, 2 }
   0x6   : > { %431 = sbr.rel (%p428_p2) target bundleno = 1299 (0x513), region = 72  ;;  %v2045_v3 = vpack.c.bf16 (!%p428_p2), %v518_v1, %v516_v0  ;;  %v517_v4 = vld [vmem:[%s3245_s2 + $0x10] sm:$0xff] (!%p428_p2)  ;;  %v520_v5 = vld [vmem:[%s3245_s2 + $0x28] sm:$0xff] (!%p428_p2)  ;;  %v522_v6 = vld [vmem:[%s3245_s2 + $0x38] sm:$0xff] (!%p428_p2)  ;;  %623 = vmatprep.mubr.f32.mxu0 (!%p428_p2), %v2308_v7  ;;  %p484_p3 = scmp.lt.s32.totalorder (!%p428_p2), %s1832_s19, 7 }
   0x7   : > { %v2047_v8 = vpack.c.bf16 (!%p428_p2), %v517_v4, %v515_v2  ;;  %v2049_v9 = vpack.c.bf16 (!%p428_p2), %v522_v6, %v520_v5  ;;  %v519_v10 = vld [vmem:[%s3245_s2 + $0x20] sm:$0xff] (!%p428_p2)  ;;  %v521_v11 = vld [vmem:[%s3245_s2 + $0x30] sm:$0xff] (!%p428_p2)  ;;  %v524_v12 = vld [vmem:[%s3245_s2 + $0x48] sm:$0xff] (!%p428_p2) }
   0x8   : > { %2046 = vmatprep.subr.bf16.mxu0 (!%p428_p2), %v2045_v3  ;;  %v526_v13 = vld [vmem:[%s3245_s2 + $0x58] sm:$0xff] (!%p428_p2)  ;;  %v2051_v14 = vpack.c.bf16 (!%p428_p2), %v521_v11, %v519_v10  ;;  %v523_v16 = vld [vmem:[%s3245_s2 + $0x40] sm:$0xff] (!%p428_p2)  ;;  %v525_v17 = vld [vmem:[%s3245_s2 + $0x50] sm:$0xff] (!%p428_p2) }
   0x9   : > { %2048 = vmatpush1.bf16.msra.mxu0 (!%p428_p2), %v2047_v8  ;;  %v2053_v15 = vpack.c.bf16 (!%p428_p2), %v526_v13, %v524_v12  ;;  %v528_v18 = vld [vmem:[%s3245_s2 + $0x68] sm:$0xff] (!%p428_p2)  ;;  %v530_v19 = vld [vmem:[%s3245_s2 + $0x78] sm:$0xff] (!%p428_p2)  ;;  %v2055_v20 = vpack.c.bf16 (!%p428_p2), %v525_v17, %v523_v16  ;;  %v527_v22 = vld [vmem:[%s3245_s2 + $0x60] sm:$0xff] (!%p428_p2) }
   0xa   : > { %2050 = vmatprep.subr.bf16.mxu0 (!%p428_p2), %v2049_v9  ;;  %v2057_v21 = vpack.c.bf16 (!%p428_p2), %v530_v19, %v528_v18  ;;  %v529_v23 = vld [vmem:[%s3245_s2 + $0x70] sm:$0xff] (!%p428_p2)  ;;  %v532_v24 = vld [vmem:[%s3245_s2 + $0x88] sm:$0xff] (!%p428_p2)  ;;  %v534_v25 = vld [vmem:[%s3245_s2 + $0x98] sm:$0xff] (!%p428_p2) }
   0xb   : > { %v531_v26 = vld [vmem:[%s3245_s2 + $0x80] sm:$0xff] (!%p428_p2)  ;;  %v2059_v27 = vpack.c.bf16 (!%p428_p2), %v529_v23, %v527_v22  ;;  %v1081_v29 = vld [vmem:[%s3247_s4 + $0x8] sm:$0xff] (!%p428_p2)  ;;  %v1082_v30 = vld [vmem:[%s3247_s4 + $0x10] sm:$0xff] (!%p428_p2)  ;;  %v2061_v31 = vpack.c.bf16 (!%p428_p2), %v534_v25, %v532_v24  ;;  %v549_v24 = vlaneseq (!%p428_p2) }
   0xc   : > { %v1080_v28 = vld [vmem:[%s3247_s4] sm:$0xff] (!%p428_p2)  ;;  %v533_v32 = vld [vmem:[%s3245_s2 + $0x90] sm:$0xff] (!%p428_p2)  ;;  %v536_v33 = vld [vmem:[%s3245_s2 + $0xa8] sm:$0xff] (!%p428_p2) }
   0xd   : > { %2052 = vmatpush1.bf16.msra.mxu0 %v2051_v14  ;;  %s3265_s19 = smov (!%p484_p3, %s1832_s19), 7  ;;  %v2077_v34 = vpack.c.bf16 %v1081_v29, %v1080_v28  ;;  %v1083_v35 = vld [vmem:[%s3247_s4 + $0x18] sm:$0xff]  ;;  %v1084_v38 = vld [vmem:[%s3247_s4 + $0x20] sm:$0xff]  ;;  %v1085_v39 = vld [vmem:[%s3247_s4 + $0x28] sm:$0xff]  ;;  %v2063_v40 = vpack.c.bf16 %v533_v32, %v531_v26  ;;  %v2586_v28 = vshrl.u32 %v549_v24, 7 }
   0xe   : > { %2054 = vmatprep.subr.bf16.mxu0 %v2053_v15  ;;  %s2471_s22 = sshll.u32 %s3265_s19, 3  ;;  %v538_v36 = vld [vmem:[%s3245_s2 + $0xb8] sm:$0xff]  ;;  %v2081_v37 = vpack.c.bf16 %v1083_v35, %v1082_v30  ;;  %v535_v41 = vld [vmem:[%s3245_s2 + $0xa0] sm:$0xff]  ;;  %v537_v43 = vld [vmem:[%s3245_s2 + $0xb0] sm:$0xff]  ;;  %v2085_v45 = vpack.c.bf16 %v1085_v39, %v1084_v38  ;;  %v2310_v24 = vmov 2475754826  }
   0xf   : > { %s2489_s17 = scalar_lea.vmem %s3243_s0, %s2471_s22  ;;  %2078 = vmatprep.subr.bf16.mxu1 %v2077_v34  ;;  %v2065_v42 = vpack.c.bf16 %v538_v36, %v536_v33  ;;  %v540_v44 = vld [vmem:[%s3245_s2 + $0xc8] sm:$0xff]  ;;  %v542_v47 = vld [vmem:[%s3245_s2 + $0xd8] sm:$0xff]  ;;  %v1086_v48 = vld [vmem:[%s3247_s4 + $0x30] sm:$0xff]  ;;  %v2067_v50 = vpack.c.bf16 %v537_v43, %v535_v41  ;;  %s2544_s27 = scalar_lea.vmem %s3244_s1, %s2471_s22  ;;  %v551_v32 = vsub.s32 0, %v2586_v28  ;;  %v555_v38 = vsub.s32 1, %v2586_v28 }
  0x10   : > { %2080 = vmatpush3.bf16.msra.mxu1 %v2077_v34  ;;  %v511_v46 = vld [vmem:[%s2489_s17] sm:$0xff]  ;;  %v1087_v49 = vld [vmem:[%s3247_s4 + $0x38] sm:$0xff]  ;;  %v2069_v51 = vpack.c.bf16 %v542_v47, %v540_v44  ;;  %v541_v53 = vld [vmem:[%s3245_s2 + $0xd0] sm:$0xff]  ;;  %s2955_s30 = scalar_lea.vmem %s3256_s13, %s2471_s22  ;;  %s505_s18 = scalar_lea.vmem %s3257_s14, %s2471_s22 }
  0x11   : > { %2056 = vmatpush1.bf16.msra.mxu0 %v2055_v20  ;;  %2082 = vmatprep.subr.bf16.mxu1 %v2081_v37  ;;  %v539_v52 = vld [vmem:[%s3245_s2 + $0xc0] sm:$0xff]  ;;  %v544_v54 = vld [vmem:[%s3245_s2 + $0xe8] sm:$0xff]  ;;  %v2089_v55 = vpack.c.bf16 %v1087_v49, %v1086_v48  ;;  %v546_v56 = vld [vmem:[%s3245_s2 + $0xf8] sm:$0xff] }
  0x12   : > { %2058 = vmatprep.subr.bf16.mxu0 %v2057_v21  ;;  %1991 = vmatprep.mubr.f32.mxu1 %v511_v46  ;;  %v1088_v57 = vld [vmem:[%s3247_s4 + $0x40] sm:$0xff]  ;;  %v1089_v58 = vld [vmem:[%s3247_s4 + $0x48] sm:$0xff]  ;;  %v2071_v59 = vpack.c.bf16 %v541_v53, %v539_v52  ;;  %v2073_v60 = vpack.c.bf16 %v546_v56, %v544_v54  ;;  %v545_v62 = vld [vmem:[%s3245_s2 + $0xf0] sm:$0xff] }
  0x13   : > { %v543_v61 = vld [vmem:[%s3245_s2 + $0xe0] sm:$0xff]  ;;  %v2093_v63 = vpack.c.bf16 %v1089_v58, %v1088_v57  ;;  %v1090_v0 = vld [vmem:[%s3247_s4 + $0x50] sm:$0xff]  ;;  %v1091_v1 = vld [vmem:[%s3247_s4 + $0x58] sm:$0xff] }
  0x14   : > { %2084 = vmatpush3.bf16.msra.mxu1 %v2081_v37  ;;  %v2075_v2 = vpack.c.bf16 %v545_v62, %v543_v61  ;;  %v2097_v3 = vpack.c.bf16 %v1091_v1, %v1090_v0  ;;  %v1092_v4 = vld [vmem:[%s3247_s4 + $0x60] sm:$0xff]  ;;  %v1093_v5 = vld [vmem:[%s3247_s4 + $0x68] sm:$0xff]  ;;  %v1094_v9 = vld [vmem:[%s3247_s4 + $0x70] sm:$0xff] }
  0x15   : > { %2060 = vmatpush1.bf16.msra.mxu0 %v2059_v27  ;;  %2086 = vmatprep.subr.bf16.mxu1 %v2085_v45  ;;  %v507_v6 = vld [vmem:[%s2544_s27] sm:$0xff]  ;;  %v2101_v8 = vpack.c.bf16 %v1093_v5, %v1092_v4  ;;  %v1095_v10 = vld [vmem:[%s3247_s4 + $0x78] sm:$0xff]  ;;  %v508_v11 = vld [vmem:[%s2544_s27 + $0x8] sm:$0xff] }
  0x16   : > { %2062 = vmatprep.subr.bf16.mxu0 %v2061_v31  ;;  %v2105_v12 = vpack.c.bf16 %v1095_v10, %v1094_v9  ;;  %v509_v13 = vld [vmem:[%s2544_s27 + $0x10] sm:$0xff]  ;;  %v510_v14 = vld [vmem:[%s2544_s27 + $0x18] sm:$0xff]  ;;  %v512_v15 = vld [vmem:[%s2489_s17 + $0x8] sm:$0xff] }
  0x17   : > { %v513_v16 = vld [vmem:[%s2489_s17 + $0x10] sm:$0xff]  ;;  %v514_v17 = vld [vmem:[%s2489_s17 + $0x18] sm:$0xff]  ;;  %v1196_v18 = vld [vmem:[%s3249_s6] sm:$0xff] }
  0x18   : > { %2088 = vmatpush3.bf16.msra.mxu1 %v2085_v45  ;;  %v1197_v19 = vld [vmem:[%s3249_s6 + $0x8] sm:$0xff]  ;;  %v1198_v21 = vld [vmem:[%s3249_s6 + $0x10] sm:$0xff]  ;;  %v1199_v22 = vld [vmem:[%s3249_s6 + $0x18] sm:$0xff] }
  0x19   : > { %2064 = vmatpush1.bf16.msra.mxu0 %v2063_v40  ;;  %2090 = vmatprep.subr.bf16.mxu1 %v2089_v55  ;;  %v2109_v20 = vpack.c.bf16 %v1197_v19, %v1196_v18  ;;  %v2113_v23 = vpack.c.bf16 %v1199_v22, %v1198_v21  ;;  %v1200_v25 = vld [vmem:[%s3249_s6 + $0x20] sm:$0xff]  ;;  %v1201_v26 = vld [vmem:[%s3249_s6 + $0x28] sm:$0xff]  ;;  %v1202_v29 = vld [vmem:[%s3249_s6 + $0x30] sm:$0xff]  ;;  %v2309_v22 = vmov 683565275  }
  0x1a   : > { %2066 = vmatprep.subr.bf16.mxu0 %v2065_v42  ;;  %v2117_v27 = vpack.c.bf16 %v1201_v26, %v1200_v25  ;;  %v1203_v30 = vld [vmem:[%s3249_s6 + $0x38] sm:$0xff]  ;;  %v1204_v33 = vld [vmem:[%s3249_s6 + $0x40] sm:$0xff]  ;;  %v1205_v34 = vld [vmem:[%s3249_s6 + $0x48] sm:$0xff] }
  0x1b   : > { %v2121_v31 = vpack.c.bf16 %v1203_v30, %v1202_v29  ;;  %v547_v35 = vld [vmem:[%s3246_s3] sm:$0x3]  ;;  %v2125_v36 = vpack.c.bf16 %v1205_v34, %v1204_v33  ;;  %v1206_v39 = vld [vmem:[%s3249_s6 + $0x50] sm:$0xff]  ;;  %v1207_v40 = vld [vmem:[%s3249_s6 + $0x58] sm:$0xff]  ;;  %v2312_v30 = vmov 2102212464  }
  0x1c   : > { %2092 = vmatpush3.bf16.msra.mxu1 %v2089_v55  ;;  %v2606_v37 = vrot.slane %v547_v35, %v551_v32  ;;  %v2129_v41 = vpack.c.bf16 %v1207_v40, %v1206_v39  ;;  %v1208_v42 = vld [vmem:[%s3249_s6 + $0x60] sm:$0xff]  ;;  %v1209_v43 = vld [vmem:[%s3249_s6 + $0x68] sm:$0xff]  ;;  %v1210_v45 = vld [vmem:[%s3249_s6 + $0x70] sm:$0xff]  ;;  %v2632_v49 = vrot.slane %v547_v35, %v555_v38  ;;  %v2313_v33 = vmov 920167782  }
  0x1d   : > { %2068 = vmatpush1.bf16.msra.mxu0 %v2067_v50  ;;  %2094 = vmatprep.subr.bf16.mxu1 %v2093_v63  ;;  %v2133_v44 = vpack.c.bf16 %v1209_v43, %v1208_v42  ;;  %v1211_v46 = vld [vmem:[%s3249_s6 + $0x78] sm:$0xff] }
  0x1e   : > { %2070 = vmatprep.subr.bf16.mxu0 %v2069_v51  ;;  %v2137_v51 = vpack.c.bf16 %v1211_v46, %v1210_v45 }
  0x20   : > { %2096 = vmatpush3.bf16.msra.mxu1 %v2093_v63 }
  0x21   : > { %2072 = vmatpush1.bf16.msra.mxu0 %v2071_v59  ;;  %2098 = vmatprep.subr.bf16.mxu1 %v2097_v3 }
  0x22   : > { %2074 = vmatprep.subr.bf16.mxu0 %v2073_v60 }
  0x24   : > { %2100 = vmatpush3.bf16.msra.mxu1 %v2097_v3 }
  0x25   : > { %2076 = vmatpush1.bf16.msra.mxu0 %v2075_v2  ;;  %2102 = vmatprep.subr.bf16.mxu1 %v2101_v8 }
  0x26   : > { %2110 = vmatprep.subr.bf16.mxu0 %v2109_v20 }
  0x28   : > { %624 = vmatmul.mubr.f32.vlgmr.msra.gmra.mrb[0].mxu0 %v507_v6  ;;  %2104 = vmatpush3.bf16.msra.mxu1 %v2101_v8 }
  0x29   : > { %629 = vmatprep.mubr.f32.mxu0 %v2308_v7  ;;  %2106 = vmatprep.subr.bf16.mxu1 %v2105_v12 }
  0x2a   : > { %2112 = vmatpush3.bf16.msra.mxu0 %v2109_v20 }
  0x2b   : > { %2114 = vmatprep.subr.bf16.mxu0 %v2113_v23 }
  0x2c   : > { %630 = vmatmul.mubr.f32.gmra.mrb[2].mxu0 %v508_v11  ;;  %2108 = vmatpush3.bf16.msra.mxu1 %v2105_v12 }
  0x2d   : > { %635 = vmatprep.mubr.f32.mxu0 %v2308_v7 }
  0x2e   : > { %2116 = vmatpush3.bf16.msra.mxu0 %v2113_v23 }
  0x2f   : > { %1992 = vmatmul.mubr.f32.vlgmr.msra.gmra.mrb[0].mxu1 %v512_v15  ;;  %2118 = vmatprep.subr.bf16.mxu0 %v2117_v27 }
  0x30   : > { %636 = vmatmul.mubr.f32.gmra.mrb[4].mxu0 %v509_v13  ;;  %1994 = vmatprep.mubr.f32.mxu1 %v513_v16 }
  0x31   : > { %641 = vmatprep.mubr.f32.mxu0 %v2308_v7 }
  0x32   : > { %2120 = vmatpush3.bf16.msra.mxu0 %v2117_v27  ;;  %v2311_v27 = vmov 2131351028  }
  0x33   : > { %1995 = vmatmul.mubr.f32.gmra.mrb[2].mxu1 %v514_v17  ;;  %2122 = vmatprep.subr.bf16.mxu0 %v2121_v31 }
  0x34   : > { %642 = vmatmul.mubr.f32.gmra.mrb[6].mxu0 %v510_v14 }
  0x36   : > { %2124 = vmatpush3.bf16.msra.mxu0 %v2121_v31 }
  0x37   : > { %2126 = vmatprep.subr.bf16.mxu0 %v2125_v36 }
  0x3a   : > { %2128 = vmatpush3.bf16.msra.mxu0 %v2125_v36 }
  0x3b   : > { %2130 = vmatprep.subr.bf16.mxu0 %v2129_v41 }
  0x3e   : > { %2132 = vmatpush3.bf16.msra.mxu0 %v2129_v41 }
  0x3f   : > { %2134 = vmatprep.subr.bf16.mxu0 %v2133_v44 }
  0x42   : > { %2136 = vmatpush3.bf16.msra.mxu0 %v2133_v44  ;;  %v2314_v44 = vmov 1326507024  }
  0x43   : > { %2138 = vmatprep.subr.bf16.mxu0 %v2137_v51 }
  0x46   : > { %2140 = vmatpush3.bf16.msra.mxu0 %v2137_v51 }
  0xfb   : > { %v625_v47 = vpop.f32.mrb[0].mxu0 }
  0xfc   : > { %v2628_v48 = vadd.f32 %v625_v47, %v2606_v37  ;;  %v627_v50 = vpop.f32.mrb[1].mxu0 }
  0xfd   : > { %v628_v56 = vadd.f32 %v627_v50, %v2632_v49 }
  0xfe   : > { %v648_v52 = vand.u32 2147483647, %v2628_v48  ;;  %v651_v53 = vand.u32 2139095040, %v2628_v48 }
  0xff   : > { %v631_v54 = vpop.f32.mrb[2].mxu0  ;;  %v2644_v1 = vmul.f32 %v628_v56, %v628_v56 }
 0x100   : > { %v652_v55 = vshrl.u32 %v651_v53, 23  ;;  %v2638_v57 = vadd.f32 %v631_v54, %v2606_v37  ;;  %v633_v58 = vpop.f32.mrb[3].mxu0  ;;  %v655_v59 = vand.u32 8388607, %v648_v52 }
 0x101   : > { %v1064_v12 = vsub.f32 0.0, %v2644_v1  ;;  %v2664_v18 = vadd.f32 %v633_v58, %v2632_v49 }
 0x102   : > { %v1840_v60 = vadd.s32 4294967169, %v652_v55  ;;  %v751_v61 = vand.u32 2147483647, %v2638_v57  ;;  %v754_v62 = vand.u32 2139095040, %v2638_v57  ;;  %v656_v2 = vor.u32 8388608, %v655_v59  ;;  %v2658_v14 = vpop.f32.mrb[0].mxu1 }
 0x103   : > { %v637_v63 = vpop.f32.mrb[4].mxu0  ;;  %v2668_v20 = vpop.f32.mrb[1].mxu1 }
 0x104   : > { %v658_v0 = vadd.s32 1, %v1840_v60  ;;  %v755_v3 = vshrl.u32 %v754_v62, 23  ;;  %v2648_v4 = vand.u32 8388607, %v751_v61  ;;  %v2650_v5 = vpop.f32.mrb[5].mxu0  ;;  %v2653_v6 = vadd.f32 %v637_v63, %v2606_v37 }
 0x105   : > { %v2660_v15 = vshll.u32 %v656_v2, 8 }
 0x106   : > { %vm659_vm0 = vcmp.gt.s32.totalorder %v658_v0, 0  ;;  %v1844_v9 = vadd.s32 4294967169, %v755_v3  ;;  %v759_v16 = vor.u32 8388608, %v2648_v4  ;;  %v857_v26 = vand.u32 2139095040, %v2653_v6  ;;  %v2676_v35 = vpop.f32.mrb[2].mxu1 }
 0x107   : > { %v660_v8 = vsel %vm659_vm0, %v658_v0, 0  ;;  %v2656_v13 = vpop.f32.mrb[6].mxu0  ;;  %v2681_v41 = vpop.f32.mrb[3].mxu1 }
 0x108   : > { %v661_v10 = vshrl.u32 %v660_v8, 5  ;;  %v662_v11 = vand.u32 31, %v660_v8  ;;  %v761_v17 = vadd.s32 1, %v1844_v9  ;;  %v2666_v19 = vpop.f32.mrb[7].mxu0 }
 0x10a   : > { %v663_v21 = vsub.s32 32, %v662_v11  ;;  %v665_v23 = vshll.u32 %v2309_v22, %v662_v11  ;;  %v668_v25 = vshll.u32 %v2310_v24, %v662_v11  ;;  %v671_v29 = vshll.u32 %v2311_v27, %v662_v11 }
 0x10b   : > { %v674_v31 = vshll.u32 %v2312_v30, %v662_v11  ;;  %v677_v34 = vshll.u32 %v2313_v33, %v662_v11  ;;  %vm680_vm1 = vcmp.lt.s32.totalorder %v661_v10, 1  ;;  %vm681_vm2 = vcmp.lt.s32.totalorder %v661_v10, 2 }
 0x10c   : > { %v666_v36 = vshrl.u32 %v2310_v24, %v663_v21  ;;  %v669_v39 = vshrl.u32 %v2311_v27, %v663_v21  ;;  %v672_v40 = vshrl.u32 %v2312_v30, %v663_v21  ;;  %v664_v42 = vshrl.u32 %v2309_v22, %v663_v21 }
 0x10d   : > { %v675_v43 = vshrl.u32 %v2313_v33, %v663_v21  ;;  %v678_v45 = vshrl.u32 %v2314_v44, %v663_v21  ;;  %vm682_vm3 = vcmp.lt.s32.totalorder %v661_v10, 3  ;;  %vm762_vm4 = vcmp.gt.s32.totalorder %v761_v17, 0 }
 0x10e   : > { %v667_v46 = vor.u32 %v666_v36, %v665_v23  ;;  %v670_v47 = vor.u32 %v669_v39, %v668_v25  ;;  %v673_v50 = vor.u32 %v672_v40, %v671_v29  ;;  %vm683_vm5 = vcmp.lt.s32.totalorder %v661_v10, 4 }
 0x10f   : > { %v676_v51 = vor.u32 %v675_v43, %v674_v31  ;;  %v679_v53 = vor.u32 %v678_v45, %v677_v34  ;;  %v763_v54 = vsel %vm762_vm4, %v761_v17, 0  ;;  %v2695_v17 = vshll.u32 %v759_v16, 8 }
 0x110   : > { %v684_v55 = vsel %vm680_vm1, %v664_v42, %v667_v46  ;;  %v685_v56 = vsel %vm683_vm5, %v673_v50, 2102212464  ;;  %v688_v58 = vsel %vm680_vm1, %v667_v46, %v670_v47  ;;  %v692_v59 = vsel %vm680_vm1, %v670_v47, %v673_v50 }
 0x111   : > { %v686_v60 = vsel %vm682_vm3, %v670_v47, %v685_v56  ;;  %v689_v62 = vsel %vm683_vm5, %v676_v51, 920167782  ;;  %v693_v63 = vsel %vm683_vm5, %v679_v53, 1326507024  ;;  %v764_v0 = vshrl.u32 %v763_v54, 5 }
 0x112   : > { %v687_v2 = vsel %vm681_vm2, %v684_v55, %v686_v60  ;;  %v690_v3 = vsel %vm682_vm3, %v673_v50, %v689_v62  ;;  %v694_v4 = vsel %vm682_vm3, %v676_v51, %v693_v63  ;;  %v765_v8 = vand.u32 31, %v763_v54 }
 0x113   : > { %v691_v9 = vsel %vm681_vm2, %v688_v58, %v690_v3  ;;  %v695_v11 = vsel %vm681_vm2, %v692_v59, %v694_v4  ;;  %v854_v21 = vand.u32 2147483647, %v2653_v6  ;;  %v703_v34 = vmul.u32 %v2660_v15, %v687_v2 }
 0x114   : > { %v2699_v23 = vmul.u32.u64.low %v2660_v15, %v695_v11  ;;  %v2700_v25 = vmul.u32.u64.high %v2660_v15, %v695_v11, %v2699_v23  ;;  %v2703_v29 = vmul.u32.u64.low %v2660_v15, %v691_v9  ;;  %v2704_v31 = vmul.u32.u64.high %v2660_v15, %v691_v9, %v2703_v29 }
 0x115   : > { %v766_v36 = vsub.s32 32, %v765_v8  ;;  %vm783_vm6 = vcmp.lt.s32.totalorder %v764_v0, 1  ;;  %v858_v39 = vshrl.u32 %v857_v26, 23  ;;  %v768_v10 = vshll.u32 %v2309_v22, %v765_v8 }
 0x116   : > { %v771_v16 = vshll.u32 %v2310_v24, %v765_v8  ;;  %v774_v40 = vshll.u32 %v2311_v27, %v765_v8  ;;  %v777_v42 = vshll.u32 %v2312_v30, %v765_v8  ;;  %v780_v47 = vshll.u32 %v2313_v33, %v765_v8 }
 0x117   : > { %v769_v43 = vshrl.u32 %v2310_v24, %v766_v36  ;;  %v772_v45 = vshrl.u32 %v2311_v27, %v766_v36  ;;  %v775_v46 = vshrl.u32 %v2312_v30, %v766_v36  ;;  %vm705_vm7 = vc.u32 %v2700_v25, %v2703_v29 }
 0x118   : > { %v706_v15 = vadd.s32 1, %v2704_v31  ;;  %v778_v26 = vshrl.u32 %v2313_v33, %v766_v36  ;;  %vm784_vm8 = vcmp.lt.s32.totalorder %v764_v0, 2  ;;  %v781_v54 = vshrl.u32 %v2314_v44, %v766_v36 }
 0x119   : > { %v770_v50 = vor.u32 %v769_v43, %v768_v10  ;;  %v773_v51 = vor.u32 %v772_v45, %v771_v16  ;;  %v776_v53 = vor.u32 %v775_v46, %v774_v40  ;;  %vm785_vm9 = vcmp.lt.s32.totalorder %v764_v0, 3 }
 0x11a   : > { %v707_v55 = vsel %vm705_vm7, %v706_v15, %v2704_v31  ;;  %v779_v56 = vor.u32 %v778_v26, %v777_v42  ;;  %vm786_vm10 = vcmp.lt.s32.totalorder %v764_v0, 4  ;;  %v767_v59 = vshrl.u32 %v2309_v22, %v766_v36 }
 0x11b   : > { %v708_v58 = vadd.s32 %v707_v55, %v703_v34  ;;  %v782_v60 = vor.u32 %v781_v54, %v780_v47  ;;  %v788_v62 = vsel %vm786_vm10, %v776_v53, 2102212464  ;;  %v791_v63 = vsel %vm783_vm6, %v770_v50, %v773_v51 }
 0x11c   : > { %v792_v2 = vsel %vm786_vm10, %v779_v56, 920167782  ;;  %v795_v3 = vsel %vm783_vm6, %v773_v51, %v776_v53  ;;  %v1848_v4 = vadd.s32 4294967169, %v858_v39  ;;  %v787_v9 = vsel %vm783_vm6, %v767_v59, %v770_v50 }
 0x11d   : > { %v709_v8 = vadd.s32 536870912, %v708_v58  ;;  %v793_v11 = vsel %vm785_vm9, %v776_v53, %v792_v2  ;;  %v796_v23 = vsel %vm786_vm10, %v782_v60, 1326507024  ;;  %v789_v31 = vsel %vm785_vm9, %v773_v51, %v788_v62 }
 0x11e   : > { %v794_v34 = vsel %vm784_vm8, %v791_v63, %v793_v11  ;;  %v797_v36 = vsel %vm785_vm9, %v779_v56, %v796_v23  ;;  %v861_v10 = vand.u32 8388607, %v854_v21  ;;  %v864_v47 = vadd.s32 1, %v1848_v4 }
 0x11f   : > { %v2730_v16 = vshrl.u32 %v709_v8, 30  ;;  %v798_v40 = vsel %vm784_vm8, %v795_v3, %v797_v36  ;;  %v2734_v39 = vmul.u32.u64.low %v2695_v17, %v794_v34  ;;  %v2735_v42 = vmul.u32.u64.high %v2695_v17, %v794_v34, %v2734_v39 }
 0x120   : > { %v2739_v43 = vmul.u32.u64.low %v2695_v17, %v798_v40  ;;  %v2740_v45 = vmul.u32.u64.high %v2695_v17, %v798_v40, %v2739_v43  ;;  %v862_v46 = vor.u32 8388608, %v861_v10  ;;  %v790_v26 = vsel %vm784_vm8, %v787_v9, %v789_v31 }
 0x121   : > { %v711_v15 = vshll.u32 %v2730_v16, 30  ;;  %v2746_v50 = vadd.f32 %v2656_v13, %v2606_v37  ;;  %v2750_v51 = vmul.f32 1.442695, %v1064_v12  ;;  %v2754_v53 = vmul.f32 %v2664_v18, %v2664_v18 }
 0x122   : > { %vm865_vm11 = vcmp.gt.s32.totalorder %v864_v47, 0  ;;  %v704_v54 = vadd.s32 %v2703_v29, %v2700_v25  ;;  %v809_v0 = vadd.s32 1, %v2735_v42  ;;  %v806_v59 = vmul.u32 %v2695_v17, %v790_v26 }
 0x123   : > { %v2757_v55 = vsub.s32 %v708_v58, %v711_v15  ;;  %v866_v56 = vsel %vm865_vm11, %v864_v47, 0  ;;  %vm808_vm12 = vc.u32 %v2740_v45, %v2734_v39  ;;  %v2763_v1 = vshll.u32 %v862_v46, 8 }
 0x124   : > { %v868_v37 = vand.u32 31, %v866_v56  ;;  %v810_v13 = vsel %vm808_vm12, %v809_v0, %v2735_v42  ;;  %v867_v18 = vshrl.u32 %v866_v56, 5  ;;  %v957_v25 = vand.u32 2147483647, %v2746_v50 }
 0x125   : > { %v714_v12 = vsub.s32 0, %v2757_v55  ;;  %v811_v29 = vadd.s32 %v810_v13, %v806_v59  ;;  %vm650_vm2 = vcmp.lt.s32.totalorder %v2628_v48, 0  ;;  %vm2812_vm3 = vcmp.le.f32.partialorder %v648_v52, 0.7853982 }
 0x126   : > { %v869_v58 = vsub.s32 32, %v868_v37  ;;  %v871_v60 = vshll.u32 %v2309_v22, %v868_v37  ;;  %v874_v62 = vshll.u32 %v2310_v24, %v868_v37  ;;  %v877_v63 = vshll.u32 %v2311_v27, %v868_v37 }
 0x127   : > { %v1841_v17 = vmin.u32 %v714_v12, %v2757_v55  ;;  %v880_v2 = vshll.u32 %v2312_v30, %v868_v37  ;;  %v883_v3 = vshll.u32 %v2313_v33, %v868_v37  ;;  %v812_v4 = vadd.s32 536870912, %v811_v29 }
 0x128   : > { %v870_v8 = vshrl.u32 %v2309_v22, %v869_v58  ;;  %v872_v9 = vshrl.u32 %v2310_v24, %v869_v58  ;;  %v875_v11 = vshrl.u32 %v2311_v27, %v869_v58  ;;  %v878_v31 = vshrl.u32 %v2312_v30, %v869_v58 }
 0x129   : > { %v716_v23 = vclz %v1841_v17  ;;  %v881_v34 = vshrl.u32 %v2313_v33, %v869_v58  ;;  %v884_v36 = vshrl.u32 %v2314_v44, %v869_v58  ;;  %v2780_v10 = vshrl.u32 %v812_v4, 30 }
 0x12a   : > { %v873_v40 = vor.u32 %v872_v9, %v871_v60  ;;  %v876_v42 = vor.u32 %v875_v11, %v874_v62  ;;  %vm886_vm13 = vcmp.lt.s32.totalorder %v867_v18, 1  ;;  %v879_v46 = vor.u32 %v878_v31, %v877_v63 }
 0x12b   : > { %v1842_v43 = vadd.s32 4294967294, %v716_v23  ;;  %v882_v47 = vor.u32 %v881_v34, %v880_v2  ;;  %v885_v15 = vor.u32 %v884_v36, %v883_v3  ;;  %v814_v26 = vshll.u32 %v2780_v10, 30 }
 0x12c   : > { %vm887_vm14 = vcmp.lt.s32.totalorder %v867_v18, 2  ;;  %vm888_vm15 = vcmp.lt.s32.totalorder %v867_v18, 3  ;;  %vm889_vm0 = vcmp.lt.s32.totalorder %v867_v18, 4  ;;  %v890_v0 = vsel %vm886_vm13, %v870_v8, %v873_v40 }
 0x12d   : > { %vm1843_vm1 = vcmp.lt.s32.totalorder %v1842_v43, 0  ;;  %v891_v56 = vsel %vm889_vm0, %v879_v46, 2102212464  ;;  %v894_v59 = vsel %vm886_vm13, %v873_v40, %v876_v42  ;;  %v2786_v12 = vsub.s32 %v811_v29, %v814_v26 }
 0x12e   : > { %v719_v37 = vsel %vm1843_vm1, 0, %v1842_v43  ;;  %v892_v13 = vsel %vm888_vm15, %v876_v42, %v891_v56  ;;  %v895_v58 = vsel %vm889_vm0, %v882_v47, 920167782  ;;  %v898_v4 = vsel %vm886_vm13, %v876_v42, %v879_v46 }
 0x12f   : > { %v720_v60 = vsub.s32 32, %v719_v37  ;;  %v721_v62 = vshll.u32 %v2757_v55, %v719_v37  ;;  %v724_v17 = vsub.s32 4294967266, %v719_v37  ;;  %v893_v63 = vsel %vm887_vm14, %v890_v0, %v892_v13 }
 0x130   : > { %v817_v2 = vsub.s32 0, %v2786_v12  ;;  %v896_v3 = vsel %vm888_vm15, %v879_v46, %v895_v58  ;;  %v899_v8 = vsel %vm889_vm0, %v885_v15, 1326507024  ;;  %v1065_v15 = vsub.f32 0.0, %v2754_v53 }
 0x131   : > { %v722_v29 = vshrl.u32 %v704_v54, %v720_v60  ;;  %v725_v9 = vadd.s32 127, %v724_v17  ;;  %v897_v11 = vsel %vm887_vm14, %v894_v59, %v896_v3  ;;  %v900_v23 = vsel %vm888_vm15, %v882_v47, %v899_v8 }
 0x132   : > { %v1845_v31 = vmin.u32 %v817_v2, %v2786_v12  ;;  %v901_v55 = vsel %vm887_vm14, %v898_v4, %v900_v23  ;;  %v2801_v34 = vmul.u32.u64.low %v2763_v1, %v897_v11  ;;  %v2802_v36 = vmul.u32.u64.high %v2763_v1, %v897_v11, %v2801_v34 }
 0x133   : > { %v723_v40 = vor.u32 %v722_v29, %v721_v62  ;;  %v726_v43 = vshll.u32 %v725_v9, 23  ;;  %v2805_v42 = vmul.u32.u64.low %v2763_v1, %v901_v55  ;;  %v2806_v46 = vmul.u32.u64.high %v2763_v1, %v901_v55, %v2805_v42 }
 0x134   : > { %v819_v54 = vclz %v1845_v31  ;;  %2256 = vpow2.f32 %v2750_v51  ;;  %v2819_v26 = vadd.f32 %v2650_v5, %v2632_v49  ;;  %v960_v0 = vand.u32 2139095040, %v2746_v50 }
 0x135   : > { %v727_v47 = vor.u32 4788187, %v726_v43  ;;  %v909_v59 = vmul.u32 %v2763_v1, %v893_v63  ;;  %v912_v53 = vadd.s32 1, %v2802_v36  ;;  %v964_v52 = vand.u32 8388607, %v957_v25 }
 0x136   : > { %v1846_v56 = vadd.s32 4294967294, %v819_v54  ;;  %v730_v13 = vcvt.s32.f32 %v723_v40  ;;  %vm911_vm4 = vc.u32 %v2806_v46, %v2801_v34  ;;  %v961_v58 = vshrl.u32 %v960_v0, 23 }
 0x137   : > { %v728_v37 = vand.u32 2147483647, %v727_v47  ;;  %vm753_vm5 = vcmp.lt.s32.totalorder %v2638_v57, 0  ;;  %v2828_v5 = vmul.f32 1.442695, %v1065_v15  ;;  %v913_v51 = vsel %vm911_vm4, %v912_v53, %v2802_v36 }
 0x138   : > { %vm1847_vm6 = vcmp.lt.s32.totalorder %v1846_v56, 0  ;;  %v965_v60 = vor.u32 8388608, %v964_v52  ;;  %v914_v17 = vadd.s32 %v913_v51, %v909_v59  ;;  %v1852_v63 = vadd.s32 4294967169, %v961_v58 }
 0x139   : > { %v731_v62 = vmul.f32 %v730_v13, %v728_v37  ;;  %v822_v1 = vsel %vm1847_vm6, 0, %v1846_v56  ;;  %v807_v2 = vadd.s32 %v2734_v39, %v2740_v45  ;;  %v734_v8 = vsub.s32 4, %v2730_v16 }
 0x13a   : > { %v823_v3 = vsub.s32 32, %v822_v1  ;;  %v827_v4 = vsub.s32 4294967266, %v822_v1  ;;  %v2835_v9 = vadd.s32 %v2801_v34, %v2806_v46  ;;  %v915_v11 = vadd.s32 536870912, %v914_v17 }
 0x13b   : > { %v732_v29 = vxor.u32 2147483648, %v731_v62  ;;  %v967_v23 = vadd.s32 1, %v1852_v63  ;;  %v824_v31 = vshll.u32 %v2786_v12, %v822_v1  ;;  %v2838_v40 = vshll.u32 %v965_v60, 8 }
 0x13c   : > { %v825_v55 = vshrl.u32 %v807_v2, %v823_v3  ;;  %v828_v36 = vadd.s32 127, %v827_v4  ;;  %v2842_v39 = vshrl.u32 %v915_v11, 30  ;;  %v837_v45 = vsub.s32 4, %v2780_v10 }
 0x13d   : > { %v733_v43 = vsel %vm650_vm2, %v732_v29, %v731_v62  ;;  %vm968_vm7 = vcmp.gt.s32.totalorder %v967_v23, 0  ;;  %v2854_v0 = vsel %vm650_vm2, %v734_v8, %v2730_v16  ;;  %vm2858_vm8 = vcmp.le.f32.partialorder %v751_v61, 0.7853982 }
 0x13e   : > { %v736_v34 = vsel %vm2812_vm3, %v2628_v48, %v733_v43  ;;  %v826_v42 = vor.u32 %v825_v55, %v824_v31  ;;  %v829_v46 = vshll.u32 %v828_v36, 23  ;;  %v969_v54 = vsel %vm968_vm7, %v967_v23, 0  ;;  %v2848_v12 = vpop.eup %2256 }
 0x13f   : > { %2258 = vcosq.f32 %v736_v34  ;;  %v917_v15 = vshll.u32 %v2842_v39, 30  ;;  %v971_v47 = vand.u32 31, %v969_v54  ;;  %v970_v52 = vshrl.u32 %v969_v54, 5 }
 0x140   : > { %2260 = vsinq.f32 %v736_v34  ;;  %v830_v59 = vor.u32 4788187, %v829_v46  ;;  %v833_v53 = vcvt.s32.f32 %v826_v42  ;;  %v838_v16 = vsel %vm753_vm5, %v837_v45, %v2780_v10 }
 0x141   : > { %v2862_v37 = vsub.s32 %v914_v17, %v917_v15  ;;  %v972_v13 = vsub.s32 32, %v971_v47  ;;  %v974_v58 = vshll.u32 %v2309_v22, %v971_v47  ;;  %v977_v60 = vshll.u32 %v2310_v24, %v971_v47 }
 0x142   : > { %v831_v51 = vand.u32 2147483647, %v830_v59  ;;  %v980_v61 = vshll.u32 %v2311_v27, %v971_v47  ;;  %v983_v62 = vshll.u32 %v2312_v30, %v971_v47  ;;  %v986_v2 = vshll.u32 %v2313_v33, %v971_v47 }
 0x143   : > { %v920_v1 = vsub.s32 0, %v2862_v37  ;;  %v975_v63 = vshrl.u32 %v2310_v24, %v972_v13  ;;  %v978_v17 = vshrl.u32 %v2311_v27, %v972_v13  ;;  %v981_v4 = vshrl.u32 %v2312_v30, %v972_v13 }
 0x144   : > { %v834_v3 = vmul.f32 %v833_v53, %v831_v51  ;;  %v984_v10 = vshrl.u32 %v2313_v33, %v972_v13  ;;  %v987_v8 = vshrl.u32 %v2314_v44, %v972_v13  ;;  %v973_v11 = vshrl.u32 %v2309_v22, %v972_v13 }
 0x145   : > { %v1849_v29 = vmin.u32 %v920_v1, %v2862_v37  ;;  %v976_v23 = vor.u32 %v975_v63, %v974_v58  ;;  %v979_v31 = vor.u32 %v978_v17, %v977_v60  ;;  %v982_v36 = vor.u32 %v981_v4, %v980_v61 }
 0x146   : > { %v835_v55 = vxor.u32 2147483648, %v834_v3  ;;  %v985_v24 = vor.u32 %v984_v10, %v983_v62  ;;  %vm989_vm9 = vcmp.lt.s32.totalorder %v970_v52, 1  ;;  %v988_v43 = vor.u32 %v987_v8, %v986_v2 }
 0x147   : > { %v922_v27 = vclz %v1849_v29  ;;  %vm990_vm10 = vcmp.lt.s32.totalorder %v970_v52, 2  ;;  %vm992_vm11 = vcmp.lt.s32.totalorder %v970_v52, 4  ;;  %vm991_vm12 = vcmp.lt.s32.totalorder %v970_v52, 3 }
 0x148   : > { %v836_v30 = vsel %vm753_vm5, %v835_v55, %v834_v3  ;;  %v994_v33 = vsel %vm992_vm11, %v982_v36, 2102212464  ;;  %v997_v44 = vsel %vm989_vm9, %v976_v23, %v979_v31  ;;  %v993_v42 = vsel %vm989_vm9, %v973_v11, %v976_v23 }
 0x149   : > { %v2259_v45 = vpop.eup %2258  ;;  %v839_v22 = vsel %vm2858_vm8, %v2638_v57, %v836_v30  ;;  %v1850_v34 = vadd.s32 4294967294, %v922_v27  ;;  %v998_v46 = vsel %vm992_vm11, %v985_v24, 920167782  ;;  %v995_v15 = vsel %vm991_vm12, %v979_v31, %v994_v33 }
 0x14a   : > { %v2261_v54 = vpop.eup %2260  ;;  %2262 = vcosq.f32 %v839_v22  ;;  %v999_v47 = vsel %vm991_vm12, %v982_v36, %v998_v46  ;;  %v1001_v59 = vsel %vm989_vm9, %v979_v31, %v982_v36  ;;  %v1002_v13 = vsel %vm992_vm11, %v988_v43, 1326507024 }
 0x14b   : > { %2264 = vsinq.f32 %v839_v22  ;;  %vm1851_vm13 = vcmp.lt.s32.totalorder %v1850_v34, 0  ;;  %v1000_v53 = vsel %vm990_vm10, %v997_v44, %v999_v47  ;;  %v1003_v51 = vsel %vm991_vm12, %v985_v24, %v1002_v13  ;;  %v1308_v13 = vld [vmem:[%s3251_s8] sm:$0xff] }
 0x14c   : > { %v925_v58 = vsel %vm1851_vm13, 0, %v1850_v34  ;;  %v2896_v60 = vmul.u32.u64.low %v2838_v40, %v1000_v53  ;;  %v2897_v61 = vmul.u32.u64.high %v2838_v40, %v1000_v53, %v2896_v60  ;;  %v996_v63 = vsel %vm990_vm10, %v993_v42, %v995_v15 }
 0x14d   : > { %v926_v62 = vsub.s32 32, %v925_v58  ;;  %v930_v1 = vsub.s32 4294967266, %v925_v58  ;;  %v1004_v17 = vsel %vm990_vm10, %v1001_v59, %v1003_v51  ;;  %v927_v2 = vshll.u32 %v2862_v37, %v925_v58 }
 0x14e   : > { %v2904_v3 = vmul.u32.u64.low %v2838_v40, %v1004_v17  ;;  %v2905_v4 = vmul.u32.u64.high %v2838_v40, %v1004_v17, %v2904_v3  ;;  %v840_v10 = vsel %vm2858_vm8, 0, %v838_v16  ;;  %vm740_vm14 = vweird.f32 %v2628_v48 }
 0x14f   : > { %v928_v8 = vshrl.u32 %v2835_v9, %v926_v62  ;;  %v931_v29 = vadd.s32 127, %v930_v1  ;;  %v844_v11 = vand.u32 3, %v840_v10  ;;  %v737_v52 = vsel %vm2812_vm3, 0, %v2854_v0  ;;  %v2927_v0 = vld [vmem:[%s3248_s5] ss:$0 sm:$0xff] }
 0x150   : > { %2266 = vpow2.f32 %v2828_v5  ;;  %v1015_v37 = vadd.s32 1, %v2897_v61  ;;  %v741_v23 = vand.u32 3, %v737_v52  ;;  %v744_v31 = vxor.u32 2147483648, %v2261_v54 }
 0x151   : > { %v929_v55 = vor.u32 %v928_v8, %v927_v2  ;;  %v932_v36 = vshll.u32 %v931_v29, 23  ;;  %vm843_vm15 = vweird.f32 %v2638_v57  ;;  %v747_v56 = vxor.u32 2147483648, %v2259_v45 }
 0x152   : > { %vm856_vm0 = vcmp.lt.s32.totalorder %v2653_v6, 0  ;;  %v1062_v9 = vmul.f32 %v2819_v26, %v2819_v26  ;;  %v1012_v16 = vmul.u32 %v2838_v40, %v996_v63  ;;  %vm1014_vm1 = vc.u32 %v2905_v4, %v2896_v60 }
 0x153   : > { %v933_v18 = vor.u32 4788187, %v932_v36  ;;  %v1016_v5 = vsel %vm1014_vm1, %v1015_v37, %v2897_v61  ;;  %vm849_vm2 = vcmp.eq.s32.totalorder %v844_v11, 2  ;;  %vm743_vm3 = vcmp.eq.s32.totalorder %v741_v23, 0 }
 0x154   : > { %v2263_v24 = vpop.eup %2262  ;;  %v1017_v27 = vadd.s32 %v1016_v5, %v1012_v16  ;;  %vm742_vm4 = vcmp.lt.s32.totalorder %v741_v23, 2  ;;  %v745_v43 = vsel %vm743_vm3, %v2259_v45, %v744_v31  ;;  %vm746_vm5 = vcmp.eq.s32.totalorder %v741_v23, 2 }
 0x155   : > { %v2265_v26 = vpop.eup %2264  ;;  %v934_v40 = vand.u32 2147483647, %v933_v18  ;;  %v936_v30 = vcvt.s32.f32 %v929_v55  ;;  %v850_v33 = vxor.u32 2147483648, %v2263_v24  ;;  %v748_v44 = vsel %vm746_vm5, %v747_v56, %v2261_v54 }
 0x156   : > { %v1018_v22 = vadd.s32 536870912, %v1017_v27  ;;  %v847_v34 = vxor.u32 2147483648, %v2265_v26  ;;  %v749_v42 = vsel %vm742_vm4, %v745_v43, %v748_v44  ;;  %v1170_v46 = vadd.f32 %v2927_v0, %v2668_v20  ;;  %v1309_v20 = vld [vmem:[%s3251_s8 + $0x8] sm:$0xff] }
 0x157   : > { %v937_v15 = vmul.f32 %v936_v30, %v934_v40  ;;  %vm846_vm6 = vcmp.eq.s32.totalorder %v844_v11, 0  ;;  %v851_v47 = vsel %vm849_vm2, %v850_v33, %v2265_v26  ;;  %v750_v45 = vsel %vm740_vm14, nan, %v749_v42 }
 0x158   : > { %v2934_v59 = vshrl.u32 %v1018_v22, 30  ;;  %vm845_vm7 = vcmp.lt.s32.totalorder %v844_v11, 2  ;;  %v848_v53 = vsel %vm846_vm6, %v2263_v24, %v847_v34  ;;  %v1076_v54 = vmul.f32 %v2848_v12, %v750_v45 }
 0x159   : > { %vm2945_vm8 = vcmp.le.f32.partialorder %v854_v21, 0.7853982  ;;  %v938_v48 = vxor.u32 2147483648, %v937_v15  ;;  %v852_v51 = vsel %vm845_vm7, %v848_v53, %v851_v47  ;;  %v1175_v61 = vadd.f32 %v2658_v14, %v2927_v0 }
 0x15a   : > { %v2267_v12 = vpop.eup %2266  ;;  %v1066_v62 = vsub.f32 0.0, %v1062_v9  ;;  %v1020_v1 = vshll.u32 %v2934_v59, 30  ;;  %v853_v21 = vsel %vm843_vm15, nan, %v852_v51  ;;  %v2960_v63 = vmul.f32 %v1170_v46, %v1076_v54 }
 0x15b   : > { %v939_v17 = vsel %vm856_vm0, %v938_v48, %v937_v15  ;;  %v1077_v14 = vmul.f32 %v2267_v12, %v853_v21  ;;  %v940_v2 = vsub.s32 4, %v2842_v39  ;;  %v2141_v3 = vpack.c.bf16 %v1309_v20, %v1308_v13 }
 0x15c   : > { %v942_v10 = vsel %vm2945_vm8, %v2653_v6, %v939_v17  ;;  %v1021_v8 = vsub.s32 %v1017_v27, %v1020_v1  ;;  %1192 = vst [vmem:[%s2955_s30] sm:$0xff] %v2960_v63  ;;  %2029 = vmatprep.mubr.f32.mxu0 %v2960_v63  ;;  %v1072_v11 = vmul.f32 1.442695, %v1066_v62  ;;  %v1013_v18 = vadd.s32 %v2896_v60, %v2905_v4 }
 0x15d   : > { %2268 = vcosq.f32 %v942_v10  ;;  %v2971_v57 = vmul.f32 %v1175_v61, %v1077_v14  ;;  %2142 = vmatprep.subr.bf16.mxu1 %v2141_v3  ;;  %v941_v52 = vsel %vm856_vm0, %v940_v2, %v2842_v39  ;;  %vm946_vm12 = vweird.f32 %v2653_v6 }
 0x15e   : > { %2270 = vsinq.f32 %v942_v10  ;;  %v1023_v29 = vsub.s32 0, %v1021_v8  ;;  %2144 = vmatpush3.bf16.msra.mxu1 %v2141_v3  ;;  %v943_v31 = vsel %vm2945_vm8, 0, %v941_v52  ;;  %v1180_v60 = vadd.f32 %v2927_v0, %v2681_v41 }
 0x15f   : > { %1193 = vst [vmem:[%s2955_s30 + $0x8] sm:$0xff] %v2971_v57  ;;  %2030 = vmatmul.mubr.f32.vlgmr.msra.gmra.mrb[8].mxu0 %v2971_v57  ;;  %2272 = vpow2.f32 %v1072_v11  ;;  %v947_v36 = vand.u32 3, %v943_v31  ;;  %v646_v15 = vadd.f32 %v2666_v19, %v2632_v49  ;;  %vm959_vm14 = vcmp.lt.s32.totalorder %v2746_v50, 0  ;;  %v1857_v11 = vld [vmem:[%s3250_s7] ss:$0 sm:$0xff] }
 0x160   : > { %v1853_v37 = vmin.u32 %v1023_v29, %v1021_v8  ;;  %vm958_vm15 = vcmp.le.f32.partialorder %v957_v25, 0.7853982  ;;  %v1043_v49 = vsub.s32 4, %v2934_v59  ;;  %vm1049_vm3 = vweird.f32 %v2746_v50 }
 0x161   : > { %vm949_vm10 = vcmp.eq.s32.totalorder %v947_v36, 0  ;;  %vm952_vm11 = vcmp.eq.s32.totalorder %v947_v36, 2  ;;  %vm948_vm13 = vcmp.lt.s32.totalorder %v947_v36, 2  ;;  %v1063_v13 = vmul.f32 %v646_v15, %v646_v15  ;;  %v1460_v15 = vld [vmem:[%s3253_s10 + $0x68] sm:$0xff] }
 0x162   : > { %v1025_v23 = vclz %v1853_v37  ;;  %v1044_v51 = vsel %vm959_vm14, %v1043_v49, %v2934_v59  ;;  %v1185_v59 = vadd.f32 %v2676_v35, %v2927_v0  ;;  %vm1317_vm4 = vcmask 130048  }
 0x163   : > { %v1067_v58 = vsub.f32 0.0, %v1063_v13  ;;  %v1046_v61 = vsel %vm958_vm15, 0, %v1044_v51  ;;  %v1461_v13 = vld [vmem:[%s3253_s10 + $0x70] sm:$0xff]  ;;  %v1468_v51 = vld [vmem:[%s3253_s10 + $0xa8] sm:$0xff] }
 0x164   : > { %v1854_v55 = vadd.s32 4294967294, %v1025_v23  ;;  %v1050_v12 = vand.u32 3, %v1046_v61  ;;  %v1470_v61 = vld [vmem:[%s3253_s10 + $0xb8] sm:$0xff] }
 0x165   : > { %v1074_v48 = vmul.f32 1.442695, %v1067_v58 }
 0x166   : > { %vm1855_vm9 = vcmp.lt.s32.totalorder %v1854_v55, 0  ;;  %vm1055_vm0 = vcmp.eq.s32.totalorder %v1050_v12, 2  ;;  %vm1052_vm1 = vcmp.eq.s32.totalorder %v1050_v12, 0  ;;  %vm1051_vm2 = vcmp.lt.s32.totalorder %v1050_v12, 2 }
 0x167   : > { %v2269_v56 = vpop.eup %2268  ;;  %v1028_v9 = vsel %vm1855_vm9, 0, %v1854_v55 }
 0x168   : > { %v2271_v16 = vpop.eup %2270  ;;  %v1029_v5 = vsub.s32 32, %v1028_v9  ;;  %v1033_v24 = vsub.s32 4294967266, %v1028_v9  ;;  %v953_v39 = vxor.u32 2147483648, %v2269_v56  ;;  %v1030_v43 = vshll.u32 %v1021_v8, %v1028_v9 }
 0x169   : > { %v950_v27 = vxor.u32 2147483648, %v2271_v16  ;;  %v2273_v4 = vpop.eup %2272 }
 0x16a   : > { %v1031_v26 = vshrl.u32 %v1013_v18, %v1029_v5  ;;  %v1034_v40 = vadd.s32 127, %v1033_v24  ;;  %v954_v30 = vsel %vm952_vm11, %v953_v39, %v2271_v16  ;;  %v1448_v18 = vld [vmem:[%s3253_s10 + $0x8] sm:$0xff]  ;;  %v1450_v5 = vld [vmem:[%s3253_s10 + $0x18] sm:$0xff]  ;;  %v1447_v24 = vld [vmem:[%s3253_s10] sm:$0xff] }
 0x16b   : > { %v951_v33 = vsel %vm949_vm10, %v2269_v56, %v950_v27  ;;  %v2145_v39 = vpack.c.bf16 %v1450_v5, %v1448_v18  ;;  %v1449_v27 = vld [vmem:[%s3253_s10 + $0x10] sm:$0xff] }
 0x16c   : > { %v1032_v44 = vor.u32 %v1031_v26, %v1030_v43  ;;  %v1035_v22 = vshll.u32 %v1034_v40, 23  ;;  %v955_v34 = vsel %vm948_vm13, %v951_v33, %v954_v30  ;;  %v1452_v43 = vld [vmem:[%s3253_s10 + $0x28] sm:$0xff]  ;;  %v1454_v26 = vld [vmem:[%s3253_s10 + $0x38] sm:$0xff]  ;;  %v2147_v40 = vpack.c.bf16 %v1449_v27, %v1447_v24  ;;  %v1451_v33 = vld [vmem:[%s3253_s10 + $0x20] sm:$0xff] }
 0x16d   : > { %v956_v42 = vsel %vm946_vm12, nan, %v955_v34  ;;  %v2149_v30 = vpack.c.bf16 %v1454_v26, %v1452_v43  ;;  %2146 = vmatprep.subr.bf16.mxu1 %v2145_v39  ;;  %v1456_v34 = vld [vmem:[%s3253_s10 + $0x48] sm:$0xff]  ;;  %v1606_v5 = vld [vmem:[%s3255_s12 + $0x10] sm:$0xff]  ;;  %v1607_v24 = vld [vmem:[%s3255_s12 + $0x18] sm:$0xff] }
 0x16e   : > { %v1036_v46 = vor.u32 4788187, %v1035_v22  ;;  %v1078_v47 = vmul.f32 %v2273_v4, %v956_v42  ;;  %v1039_v53 = vcvt.s32.f32 %v1032_v44  ;;  %v1453_v44 = vld [vmem:[%s3253_s10 + $0x30] sm:$0xff]  ;;  %v1455_v4 = vld [vmem:[%s3253_s10 + $0x40] sm:$0xff]  ;;  %v1625_v27 = vld [vmem:[%s3255_s12 + $0xa8] sm:$0xff]  ;;  %v3142_v43 = vpack.c.bf16 %v1607_v24, %v1606_v5 }
 0x16f   : > { %v2151_v22 = vpack.c.bf16 %v1453_v44, %v1451_v33  ;;  %v1624_v39 = vld [vmem:[%s3255_s12 + $0xa0] sm:$0xff]  ;;  %v1626_v33 = vld [vmem:[%s3255_s12 + $0xb0] sm:$0xff]  ;;  %v1627_v44 = vld [vmem:[%s3255_s12 + $0xb8] sm:$0xff] }
 0x170   : > { %v1037_v45 = vand.u32 2147483647, %v1036_v46  ;;  %v2988_v54 = vmul.f32 %v1180_v60, %v1078_v47  ;;  %v1458_v60 = vld [vmem:[%s3253_s10 + $0x58] sm:$0xff]  ;;  %v1457_v46 = vld [vmem:[%s3253_s10 + $0x50] sm:$0xff]  ;;  %v2185_v26 = vpack.c.bf16 %v1625_v27, %v1624_v39 }
 0x171   : > { %v2153_v42 = vpack.c.bf16 %v1458_v60, %v1456_v34  ;;  %v1462_v47 = vld [vmem:[%s3253_s10 + $0x78] sm:$0xff]  ;;  %v2189_v34 = vpack.c.bf16 %v1627_v44, %v1626_v33  ;;  %v1610_v60 = vld [vmem:[%s3255_s12 + $0x30] sm:$0xff] }
 0x172   : > { %v1040_v6 = vmul.f32 %v1039_v53, %v1037_v45  ;;  %1194 = vst [vmem:[%s2955_s30 + $0x10] sm:$0xff] %v2988_v54  ;;  %2032 = vmatprep.mubr.f32.mxu0 %v2988_v54  ;;  %v2155_v45 = vpack.c.bf16 %v1457_v46, %v1455_v4  ;;  %v2157_v53 = vpack.c.bf16 %v1462_v47, %v1460_v15  ;;  %v1611_v4 = vld [vmem:[%s3255_s12 + $0x38] sm:$0xff]  ;;  %v1629_v46 = vld [vmem:[%s3255_s12 + $0xc8] sm:$0xff]  ;;  %v2298_v24 = vld [vmem:[%s2544_s27 + $0x10] sm:$0xff] }
 0x173   : > { %v2191_v15 = vpack.c.bf16 %v1611_v4, %v1610_v60  ;;  %v1634_v44 = vld [vmem:[%s3255_s12 + $0xf0] sm:$0xff]  ;;  %v1619_v4 = vld [vmem:[%s3255_s12 + $0x78] sm:$0xff] }
 0x174   : > { %v1041_v20 = vxor.u32 2147483648, %v1040_v6  ;;  %v1618_v60 = vld [vmem:[%s3255_s12 + $0x70] sm:$0xff] }
 0x176   : > { %v1042_v41 = vsel %vm959_vm14, %v1041_v20, %v1040_v6  ;;  %v1459_v6 = vld [vmem:[%s3253_s10 + $0x60] sm:$0xff]  ;;  %v1464_v20 = vld [vmem:[%s3253_s10 + $0x88] sm:$0xff] }
 0x177   : > { %v1045_v19 = vsel %vm958_vm15, %v2746_v50, %v1042_v41  ;;  %v1466_v41 = vld [vmem:[%s3253_s10 + $0x98] sm:$0xff]  ;;  %v2159_v58 = vpack.c.bf16 %v1461_v13, %v1459_v6  ;;  %v1630_v6 = vld [vmem:[%s3255_s12 + $0xd0] sm:$0xff] }
 0x178   : > { %2274 = vcosq.f32 %v1045_v19  ;;  %v2161_v49 = vpack.c.bf16 %v1466_v41, %v1464_v20  ;;  %v1631_v13 = vld [vmem:[%s3255_s12 + $0xd8] sm:$0xff] }
 0x179   : > { %2276 = vsinq.f32 %v1045_v19  ;;  %v1463_v19 = vld [vmem:[%s3253_s10 + $0x80] sm:$0xff]  ;;  %v2197_v41 = vpack.c.bf16 %v1631_v13, %v1630_v6 }
 0x17a   : > { %2278 = vpow2.f32 %v1074_v48  ;;  %v1465_v48 = vld [vmem:[%s3253_s10 + $0x90] sm:$0xff] }
 0x17b   : > { %v2163_v12 = vpack.c.bf16 %v1465_v48, %v1463_v19  ;;  %v1858_v48 = vld [vmem:[%s3252_s9] ss:$0 sm:$0xff] }
 0x182   : > { %v2275_v62 = vpop.eup %2274 }
 0x183   : > { %v2277_v1 = vpop.eup %2276  ;;  %v1056_v21 = vxor.u32 2147483648, %v2275_v62 }
 0x184   : > { %v1053_v17 = vxor.u32 2147483648, %v2277_v1  ;;  %v2279_v3 = vpop.eup %2278 }
 0x185   : > { %v1057_v25 = vsel %vm1055_vm0, %v1056_v21, %v2277_v1  ;;  %v1467_v1 = vld [vmem:[%s3253_s10 + $0xa0] sm:$0xff]  ;;  %v1469_v21 = vld [vmem:[%s3253_s10 + $0xb0] sm:$0xff] }
 0x186   : > { %v1054_v14 = vsel %vm1052_vm1, %v2275_v62, %v1053_v17  ;;  %v2165_v62 = vpack.c.bf16 %v1470_v61, %v1468_v51  ;;  %v1472_v17 = vld [vmem:[%s3253_s10 + $0xc8] sm:$0xff] }
 0x187   : > { %v1058_v2 = vsel %vm1051_vm2, %v1054_v14, %v1057_v25  ;;  %v1474_v25 = vld [vmem:[%s3253_s10 + $0xd8] sm:$0xff]  ;;  %v2167_v14 = vpack.c.bf16 %v1469_v21, %v1467_v1 }
 0x188   : > { %v1059_v10 = vsel %vm1049_vm3, nan, %v1058_v2  ;;  %v2169_v2 = vpack.c.bf16 %v1474_v25, %v1472_v17 }
 0x189   : > { %v1079_v8 = vmul.f32 %v2279_v3, %v1059_v10  ;;  %v1471_v3 = vld [vmem:[%s3253_s10 + $0xc0] sm:$0xff]  ;;  %v1473_v10 = vld [vmem:[%s3253_s10 + $0xd0] sm:$0xff] }
 0x18b   : > { %v3002_v29 = vmul.f32 %v1185_v59, %v1079_v8  ;;  %v1476_v8 = vld [vmem:[%s3253_s10 + $0xe8] sm:$0xff]  ;;  %v1478_v59 = vld [vmem:[%s3253_s10 + $0xf8] sm:$0xff] }
 0x18d   : > { %1195 = vst [vmem:[%s2955_s30 + $0x18] sm:$0xff] %v3002_v29  ;;  %2033 = vmatmul.mubr.f32.gmra.mrb[10].mxu0 %v3002_v29 }
 0x232   : > { %v2031_v52 = vpop.f32.mrb[8].mxu0 }
 0x233   : > { %v1291_v37 = vadd.f32 %v2031_v52, %v1857_v11  ;;  %v1285_v50 = vpop.f32.mrb[9].mxu0  ;;  %v2173_v52 = vpack.c.bf16 %v1478_v59, %v1476_v8  ;;  %v2296_v59 = vld [vmem:[%s2544_s27] sm:$0xff] }
 0x234   : > { %v1286_v23 = vadd.f32 %v1857_v11, %v1285_v50  ;;  %v1477_v50 = vld [vmem:[%s3253_s10 + $0xf0] sm:$0xff] }
 0x235   : > { %v1305_v55 = vmax.f32 %v1291_v37, 0.0  ;;  %v1475_v37 = vld [vmem:[%s3253_s10 + $0xe0] sm:$0xff] }
 0x236   : > { %v1304_v31 = vmax.f32 %v1286_v23, 0.0  ;;  %v1620_v23 = vld [vmem:[%s3255_s12 + $0x80] sm:$0xff] }
 0x238   : > { %2039 = vmatprep.mubr.msk.f32.mxu1 %vm1317_vm4, %v1304_v31  ;;  %v1621_v31 = vld [vmem:[%s3255_s12 + $0x88] sm:$0xff] }
 0x239   : > { %2040 = vmatmul.mubr.msk.f32.vlgmr.msra.gmra.mrb[4].mxu1 %vm1317_vm4, %v1305_v55  ;;  %v1604_v55 = vld [vmem:[%s3255_s12] sm:$0xff] }
 0x23a   : > { %2148 = vmatpush1.bf16.msra.mxu1 %v2147_v40  ;;  %v1608_v40 = vld [vmem:[%s3255_s12 + $0x20] sm:$0xff] }
 0x23b   : > { %2150 = vmatprep.subr.bf16.mxu1 %v2149_v30  ;;  %v1609_v30 = vld [vmem:[%s3255_s12 + $0x28] sm:$0xff] }
 0x23e   : > { %2152 = vmatpush1.bf16.msra.mxu1 %v2151_v22  ;;  %v2187_v22 = vpack.c.bf16 %v1609_v30, %v1608_v40  ;;  %v1632_v40 = vld [vmem:[%s3255_s12 + $0xe0] sm:$0xff]  ;;  %v1633_v30 = vld [vmem:[%s3255_s12 + $0xe8] sm:$0xff] }
 0x23f   : > { %2154 = vmatprep.subr.bf16.mxu1 %v2153_v42  ;;  %v1628_v42 = vld [vmem:[%s3255_s12 + $0xc0] sm:$0xff]  ;;  %v2201_v33 = vpack.c.bf16 %v1633_v30, %v1632_v40 }
 0x240   : > { %v2193_v47 = vpack.c.bf16 %v1629_v46, %v1628_v42  ;;  %v2207_v42 = vpack.c.bf16 %v1619_v4, %v1618_v60  ;;  %v1479_v46 = vld [vmem:[%s3254_s11] sm:$0x3] }
 0x242   : > { %2156 = vmatpush1.bf16.msra.mxu1 %v2155_v45  ;;  %v1612_v45 = vld [vmem:[%s3255_s12 + $0x40] sm:$0xff] }
 0x243   : > { %2158 = vmatprep.subr.bf16.mxu1 %v2157_v53  ;;  %v1613_v53 = vld [vmem:[%s3255_s12 + $0x48] sm:$0xff] }
 0x244   : > { %v2195_v20 = vpack.c.bf16 %v1613_v53, %v1612_v45 }
 0x246   : > { %2160 = vmatpush1.bf16.msra.mxu1 %v2159_v58  ;;  %v1614_v58 = vld [vmem:[%s3255_s12 + $0x50] sm:$0xff] }
 0x247   : > { %2162 = vmatprep.subr.bf16.mxu1 %v2161_v49  ;;  %v1615_v49 = vld [vmem:[%s3255_s12 + $0x58] sm:$0xff] }
 0x248   : > { %v2199_v19 = vpack.c.bf16 %v1615_v49, %v1614_v58 }
 0x24a   : > { %2164 = vmatpush1.bf16.msra.mxu1 %v2163_v12 }
 0x24b   : > { %2166 = vmatprep.subr.bf16.mxu1 %v2165_v62 }
 0x24e   : > { %2168 = vmatpush1.bf16.msra.mxu1 %v2167_v14 }
 0x24f   : > { %2170 = vmatprep.subr.bf16.mxu1 %v2169_v2 }
 0x260   : > { %v2034_v35 = vpop.f32.mrb[10].mxu0 }
 0x261   : > { %v1301_v0 = vadd.f32 %v2034_v35, %v1857_v11  ;;  %v1295_v36 = vpop.f32.mrb[11].mxu0  ;;  %v2175_v35 = vpack.c.bf16 %v1477_v50, %v1475_v37  ;;  %v2297_v37 = vld [vmem:[%s2544_s27 + $0x8] sm:$0xff] }
 0x262   : > { %v1296_v56 = vadd.f32 %v1857_v11, %v1295_v36  ;;  %v2171_v11 = vpack.c.bf16 %v1473_v10, %v1471_v3  ;;  %v1605_v36 = vld [vmem:[%s3255_s12 + $0x8] sm:$0xff] }
 0x263   : > { %v1307_v16 = vmax.f32 %v1301_v0, 0.0  ;;  %v2177_v0 = vpack.c.bf16 %v1621_v31, %v1620_v23 }
 0x264   : > { %v1306_v9 = vmax.f32 %v1296_v56, 0.0  ;;  %2172 = vmatpush1.bf16.msra.mxu1 %v2171_v11  ;;  %v1622_v56 = vld [vmem:[%s3255_s12 + $0x90] sm:$0xff] }
 0x265   : > { %2174 = vmatprep.subr.bf16.mxu1 %v2173_v52  ;;  %2178 = vmatprep.subr.bf16.mxu0 %v2177_v0 }
 0x266   : > { %2042 = vmatprep.mubr.msk.f32.mxu1 %vm1317_vm4, %v1306_v9  ;;  %v1623_v9 = vld [vmem:[%s3255_s12 + $0x98] sm:$0xff] }
 0x267   : > { %2043 = vmatmul.mubr.msk.f32.gmra.mrb[6].mxu1 %vm1317_vm4, %v1307_v16  ;;  %v3125_v16 = vpack.c.bf16 %v1605_v36, %v1604_v55  ;;  %v3127_v18 = vpack.c.bf16 %v1623_v9, %v1622_v56 }
 0x268   : > { %1555 = vmatprep.mubr.f32.mxu1 %v2308_v7  ;;  %2176 = vmatpush1.bf16.msra.mxu1 %v2175_v35 }
 0x269   : > { %2180 = vmatpush3.bf16.msra.mxu0 %v3125_v16  ;;  %2209 = vmatprep.subr.bf16.mxu1 %v2177_v0 }
 0x26a   : > { %2182 = vmatprep.subr.bf16.mxu0 %v3127_v18 }
 0x26d   : > { %2184 = vmatpush3.bf16.msra.mxu0 %v3142_v43 }
 0x26e   : > { %2186 = vmatprep.subr.bf16.mxu0 %v2185_v26 }
 0x271   : > { %2188 = vmatpush3.bf16.msra.mxu0 %v2187_v22 }
 0x272   : > { %2190 = vmatprep.subr.bf16.mxu0 %v2189_v34 }
 0x275   : > { %2192 = vmatpush3.bf16.msra.mxu0 %v2191_v15 }
 0x276   : > { %2194 = vmatprep.subr.bf16.mxu0 %v2193_v47 }
 0x279   : > { %2196 = vmatpush3.bf16.msra.mxu0 %v2195_v20 }
 0x27a   : > { %2198 = vmatprep.subr.bf16.mxu0 %v2197_v41 }
 0x27d   : > { %2200 = vmatpush3.bf16.msra.mxu0 %v2199_v19 }
 0x27e   : > { %2202 = vmatprep.subr.bf16.mxu0 %v2201_v33 }
 0x30c   : > { %v2041_v51 = vpop.f32.mrb[4].mxu1 }
 0x30d   : > { %v1402_v61 = vadd.f32 %v2041_v51, %v1858_v48  ;;  %v1396_v12 = vpop.f32.mrb[5].mxu1 }
 0x30e   : > { %v1397_v62 = vadd.f32 %v1858_v48, %v1396_v12 }
 0x30f   : > { %v1864_v1 = vmul.f32 -1.442695, %v1402_v61 }
 0x310   : > { %v1863_v21 = vmul.f32 -1.442695, %v1397_v62 }
 0x311   : > { %2280 = vpow2.f32 %v1864_v1 }
 0x312   : > { %2282 = vpow2.f32 %v1863_v21 }
 0x31b   : > { %v2281_v17 = vpop.eup %2280 }
 0x31c   : > { %v2283_v25 = vpop.eup %2282  ;;  %v1428_v14 = vadd.f32 1.0, %v2281_v17 }
 0x31d   : > { %v1427_v2 = vadd.f32 1.0, %v2283_v25 }
 0x31e   : > { %2284 = vrcp.f32 %v1428_v14 }
 0x31f   : > { %2286 = vrcp.f32 %v1427_v2 }
 0x328   : > { %v2285_v3 = vpop.eup %2284 }
 0x329   : > { %v2287_v10 = vpop.eup %2286  ;;  %v1440_v52 = vmul.f32 %v2285_v3, %v2971_v57 }
 0x32a   : > { %v1439_v8 = vmul.f32 %v2287_v10, %v2960_v63 }
 0x32b   : > { %v1444_v50 = vadd.f32 %v2297_v37, %v1440_v52 }
 0x32c   : > { %v1443_v11 = vadd.f32 %v2296_v59, %v1439_v8 }
 0x32e   : > { %1556 = vmatmul.mubr.f32.vlgmr.msra.gmra.mrb[8].mxu1 %v1443_v11 }
 0x32f   : > { %1561 = vmatprep.mubr.f32.mxu1 %v2308_v7  ;;  %2217 = vmatpush3.bf16.msra.mxu1 %v3125_v16 }
 0x330   : > { %2210 = vmatprep.subr.bf16.mxu1 %v3127_v18 }
 0x332   : > { %1562 = vmatmul.mubr.f32.gmra.mrb[10].mxu1 %v1444_v50 }
 0x333   : > { %1567 = vmatprep.mubr.f32.mxu1 %v2308_v7  ;;  %2218 = vmatpush3.bf16.msra.mxu1 %v3142_v43  ;;  %v2299_v43 = vld [vmem:[%s2544_s27 + $0x18] sm:$0xff] }
 0x334   : > { %2211 = vmatprep.subr.bf16.mxu1 %v2185_v26 }
 0x337   : > { %2219 = vmatpush3.bf16.msra.mxu1 %v2187_v22  ;;  %v1635_v22 = vld [vmem:[%s3255_s12 + $0xf8] sm:$0xff] }
 0x338   : > { %2212 = vmatprep.subr.bf16.mxu1 %v2189_v34  ;;  %v2205_v34 = vpack.c.bf16 %v1635_v22, %v1634_v44 }
 0x33a   : > { %v2044_v63 = vpop.f32.mrb[6].mxu1 }
 0x33b   : > { %v1412_v23 = vadd.f32 %v2044_v63, %v1858_v48  ;;  %v1406_v57 = vpop.f32.mrb[7].mxu1  ;;  %2220 = vmatpush3.bf16.msra.mxu1 %v2191_v15  ;;  %v1484_v15 = vrot.slane %v1479_v46, %v551_v32 }
 0x33c   : > { %v1407_v31 = vadd.f32 %v1858_v48, %v1406_v57  ;;  %2213 = vmatprep.subr.bf16.mxu1 %v2193_v47  ;;  %v1488_v47 = vrot.slane %v1479_v46, %v555_v38 }
 0x33d   : > { %v1866_v55 = vmul.f32 -1.442695, %v1412_v23 }
 0x33e   : > { %v1865_v35 = vmul.f32 -1.442695, %v1407_v31 }
 0x33f   : > { %2288 = vpow2.f32 %v1866_v55  ;;  %2221 = vmatpush3.bf16.msra.mxu1 %v2195_v20 }
 0x340   : > { %2290 = vpow2.f32 %v1865_v35  ;;  %2214 = vmatprep.subr.bf16.mxu1 %v2197_v41 }
 0x343   : > { %2222 = vmatpush3.bf16.msra.mxu1 %v2199_v19 }
 0x344   : > { %2215 = vmatprep.subr.bf16.mxu1 %v2201_v33 }
 0x349   : > { %v2289_v0 = vpop.eup %2288 }
 0x34a   : > { %v2291_v36 = vpop.eup %2290  ;;  %v1430_v56 = vadd.f32 1.0, %v2289_v0 }
 0x34b   : > { %v1429_v9 = vadd.f32 1.0, %v2291_v36 }
 0x34c   : > { %2292 = vrcp.f32 %v1430_v56 }
 0x34d   : > { %2294 = vrcp.f32 %v1429_v9 }
 0x356   : > { %v2293_v16 = vpop.eup %2292 }
 0x357   : > { %v2295_v18 = vpop.eup %2294  ;;  %v1442_v27 = vmul.f32 %v2293_v16, %v3002_v29 }
 0x358   : > { %v1441_v5 = vmul.f32 %v2295_v18, %v2988_v54  ;;  %v1616_v54 = vld [vmem:[%s3255_s12 + $0x60] sm:$0xff] }
 0x359   : > { %v1446_v26 = vadd.f32 %v2299_v43, %v1442_v27 }
 0x35a   : > { %v1445_v39 = vadd.f32 %v2298_v24, %v1441_v5 }
 0x35c   : > { %1568 = vmatmul.mubr.f32.gmra.mrb[12].mxu1 %v1445_v39 }
 0x35d   : > { %1573 = vmatprep.mubr.f32.mxu1 %v2308_v7  ;;  %v1617_v7 = vld [vmem:[%s3255_s12 + $0x68] sm:$0xff] }
 0x35e   : > { %v2203_v29 = vpack.c.bf16 %v1617_v7, %v1616_v54 }
 0x360   : > { %1574 = vmatmul.mubr.f32.gmra.mrb[14].mxu1 %v1446_v26  ;;  %2204 = vmatpush3.bf16.msra.mxu0 %v2203_v29 }
 0x361   : > { %2223 = vmatpush3.bf16.msra.mxu1 %v2203_v29  ;;  %2206 = vmatprep.subr.bf16.mxu0 %v2205_v34 }
 0x362   : > { %2216 = vmatprep.subr.bf16.mxu1 %v2205_v34 }
 0x364   : > { %2208 = vmatpush3.bf16.msra.mxu0 %v2207_v42 }
 0x365   : > { %2224 = vmatpush3.bf16.msra.mxu1 %v2207_v42 }
 0x401   : > { %v1557_v45 = vpop.f32.mrb[8].mxu1 }
 0x402   : > { %v1558_v53 = vadd.f32 %v1557_v45, %v1484_v15  ;;  %v1559_v6 = vpop.f32.mrb[9].mxu1 }
 0x403   : > { %v1560_v13 = vadd.f32 %v1559_v6, %v1488_v47 }
 0x404   : > { %v1588_v20 = vmul.f32 0.01, %v1558_v53  ;;  %vm1580_vm5 = vcmp.gt.f32.partialorder %v1558_v53, 0.0 }
 0x405   : > { %v1589_v41 = vmul.f32 0.01, %v1560_v13  ;;  %v1563_v58 = vpop.f32.mrb[10].mxu1  ;;  %vm1581_vm6 = vcmp.gt.f32.partialorder %v1560_v13, 0.0 }
 0x406   : > { %v1564_v49 = vadd.f32 %v1563_v58, %v1484_v15  ;;  %v1565_v19 = vpop.f32.mrb[11].mxu1  ;;  %v1596_v61 = vsel %vm1580_vm5, %v1558_v53, %v1588_v20 }
 0x407   : > { %v1566_v48 = vadd.f32 %v1565_v19, %v1488_v47  ;;  %v1597_v51 = vsel %vm1581_vm6, %v1560_v13, %v1589_v41 }
 0x408   : > { %v1590_v12 = vmul.f32 0.01, %v1564_v49  ;;  %1700 = vmatprep.mubr.f32.mxu0 %v1597_v51  ;;  %vm1582_vm8 = vcmp.gt.f32.partialorder %v1564_v49, 0.0 }
 0x409   : > { %v1591_v32 = vmul.f32 0.01, %v1566_v48  ;;  %1701 = vmatmul.mubr.f32.vlgmr.msra.gmra.mrb[12].mxu0 %v1596_v61  ;;  %vm1583_vm7 = vcmp.gt.f32.partialorder %v1566_v48, 0.0 }
 0x40a   : > { %v1598_v38 = vsel %vm1582_vm8, %v1564_v49, %v1590_v12 }
 0x40b   : > { %v1599_v28 = vsel %vm1583_vm7, %v1566_v48, %v1591_v32 }
 0x40c   : > { %1705 = vmatprep.mubr.f32.mxu0 %v1599_v28 }
 0x40d   : > { %1706 = vmatmul.mubr.f32.gmra.mrb[14].mxu0 %v1598_v38 }
 0x42f   : > { %v1569_v62 = vpop.f32.mrb[12].mxu1 }
 0x430   : > { %v1570_v1 = vadd.f32 %v1569_v62, %v1484_v15  ;;  %v1571_v21 = vpop.f32.mrb[13].mxu1 }
 0x431   : > { %v1572_v17 = vadd.f32 %v1571_v21, %v1488_v47 }
 0x432   : > { %v1592_v25 = vmul.f32 0.01, %v1570_v1  ;;  %vm1584_vm10 = vcmp.gt.f32.partialorder %v1570_v1, 0.0 }
 0x433   : > { %v1593_v14 = vmul.f32 0.01, %v1572_v17  ;;  %v1575_v2 = vpop.f32.mrb[14].mxu1  ;;  %vm1585_vm9 = vcmp.gt.f32.partialorder %v1572_v17, 0.0 }
 0x434   : > { %v1576_v3 = vadd.f32 %v1575_v2, %v1484_v15  ;;  %v1577_v10 = vpop.f32.mrb[15].mxu1  ;;  %v1600_v52 = vsel %vm1584_vm10, %v1570_v1, %v1592_v25 }
 0x435   : > { %v1578_v8 = vadd.f32 %v1577_v10, %v1488_v47  ;;  %v1601_v59 = vsel %vm1585_vm9, %v1572_v17, %v1593_v14 }
 0x436   : > { %v1594_v11 = vmul.f32 0.01, %v1576_v3  ;;  %1710 = vmatprep.mubr.f32.mxu0 %v1601_v59  ;;  %vm1586_vm11 = vcmp.gt.f32.partialorder %v1576_v3, 0.0 }
 0x437   : > { %v1595_v37 = vmul.f32 0.01, %v1578_v8  ;;  %1711 = vmatmul.mubr.f32.gmra.mrb[16].mxu0 %v1600_v52  ;;  %vm1587_vm12 = vcmp.gt.f32.partialorder %v1578_v8, 0.0 }
 0x438   : > { %v1602_v63 = vsel %vm1586_vm11, %v1576_v3, %v1594_v11 }
 0x439   : > { %v1603_v50 = vsel %vm1587_vm12, %v1578_v8, %v1595_v37 }
 0x43a   : > { %1715 = vmatprep.mubr.f32.mxu1 %v1603_v50 }
 0x43b   : > { %1716 = vmatmul.mubr.f32.vlgmr.msra.gmra.mrb[16].mxu1 %v1602_v63 }
 0x4dc   : > { %v1947_v23 = vpop.f32.mrb[12].mxu0 }
 0x4dd   : > { %v1948_v57 = vpop.f32.mrb[13].mxu0 }
 0x4de   : > { %v1949_v31 = vadd.f32 %v1948_v57, %v1947_v23 }
 0x4e0   : > { %1721 = vst [vmem:[%s505_s18] sm:$0xff] %v1949_v31  ;;  %v1950_v55 = vpop.f32.mrb[14].mxu0 }
 0x4e1   : > { %v1951_v35 = vpop.f32.mrb[15].mxu0 }
 0x4e2   : > { %v1952_v0 = vadd.f32 %v1951_v35, %v1950_v55 }
 0x4e4   : > { %1722 = vst [vmem:[%s505_s18 + $0x8] sm:$0xff] %v1952_v0 }
 0x50a   : > { %v1953_v36 = vpop.f32.mrb[16].mxu0 }
 0x50b   : > { %v1954_v56 = vpop.f32.mrb[17].mxu0 }
 0x50c   : > { %v1955_v9 = vadd.f32 %v1954_v56, %v1953_v36 }
 0x50e   : > { %1723 = vst [vmem:[%s505_s18 + $0x10] sm:$0xff] %v1955_v9  ;;  %v1956_v16 = vpop.f32.mrb[16].mxu1 }
 0x50f   : > { %v1957_v18 = vpop.f32.mrb[17].mxu1 }
 0x510   : > { %v1958_v5 = vadd.f32 %v1957_v18, %v1956_v16 }
 0x512   : > { %1724 = vst [vmem:[%s505_s18 + $0x18] sm:$0xff] %v1958_v5 }
 0x513 PF: > { %s25_s29 = sadd.s32 1, %s2306_s29  }
 0x514   : > { %p22_p4 = scmp.ge.s32.totalorder %s25_s29, 4  }
 0x516   :  { %24 = sbr.rel (!%p22_p4) target bundleno = 1 (0x1), region = 117 }

</bundles_post_ra>
